<compile_context>
chip_gen: v7x
topology: tpu7x:2x2x1
jax: 0.10.0
libtpu: 0.0.40
codegen_flags: <defaults>
</compile_context>

<pallas_src>
import functools

import jax
import jax.numpy as jnp
import numpy as np
from jax import lax
from jax.experimental import pallas as pl
from jax.experimental.pallas import tpu as pltpu


# -----------------------------------------------------------------------------
# MRI forward / adjoint operators (FFT-based -> stay in XLA).
# -----------------------------------------------------------------------------
def fmult(x, smps, mask):
    """x: (B, H, W) complex image -> masked multicoil k-space (B, Nc, H, W)."""
    return mask * jnp.fft.fft2(smps * x[:, None, :, :], norm="ortho")


def ftran(y, smps, mask):
    """Adjoint of fmult: (B, Nc, H, W) k-space -> (B, H, W) complex image."""
    return jnp.sum(jnp.conj(smps) * jnp.fft.ifft2(mask * y, norm="ortho"), axis=1)


# -----------------------------------------------------------------------------
# Pallas kernel: fused (denoiser CNN + PnP/RED update) for one block of images.
# -----------------------------------------------------------------------------
def _dub_kernel(scal_ref, masks_ref, x_ref, dc_ref, w1_ref, beff_ref, w2_ref,
                b2_ref, out_ref, xbuf_ref, hbuf_ref, p1_ref, p2_ref,
                *, width, pad):
    """Lane-dense layout: every tensor is (channels, pixels), pixels = Nt*H*W.

    scal_ref : SMEM (1, 4) f32  [g_in, c_prior, c_x, c_dc]
    masks_ref: VMEM (9, Mb)     per-tap edge-validity masks (1 inside, 0 outside)
    x_ref    : VMEM (Cin, Mb)   current iterate (real/imag channels)
    dc_ref   : VMEM (Cin, Mb)   data-consistency term (real/imag channels)
    w1_ref   : VMEM (Cmid, 9*Cin)   conv1 weights in im2col form (tap-major cols)
    beff_ref : VMEM (Cmid, 1)       b1 + sigma*semb (folded once in the wrapper)
    w2_ref   : VMEM (Cout, 9*Cmid)  conv2 weights in im2col form
    b2_ref   : VMEM (Cout, 1)
    out_ref  : VMEM (Cout, Mb)      lane-dense output block
    xbuf_ref : VMEM scratch (Cin,  Mb + 2*pad)  zero-haloed conv1 input
    hbuf_ref : VMEM scratch (Cmid, Mb + 2*pad)  zero-haloed hidden activations
    p1_ref   : VMEM scratch (9*Cin,  Mb)        conv1 im2col patch matrix
    p2_ref   : VMEM scratch (9*Cmid, Mb)        conv2 im2col patch matrix
    """
    cin, mb = x_ref.shape
    cmid = beff_ref.shape[0]

    g_in = scal_ref[0, 0]
    c_prior = scal_ref[0, 1]
    c_x = scal_ref[0, 2]
    c_dc = scal_ref[0, 3]

    x = x_ref[...]
    dc = dc_ref[...]
    xn = x - g_in * dc                        # denoiser input (x for RED, x-gamma*dc for PnP)

    # ---- stage conv1 input into the zero-haloed pixel buffer (aligned 128-lane halo) ----
    xbuf_ref[:, 0:pad] = jnp.zeros((cin, pad), jnp.float32)
    xbuf_ref[:, pad + mb:2 * pad + mb] = jnp.zeros((cin, pad), jnp.float32)
    xbuf_ref[:, pad:pad + mb] = xn

    # ---- conv1: build im2col patch (9*Cin, Mb), then ONE matmul on the MXU ----
    for t in range(9):
        dy, dx = t // 3 - 1, t % 3 - 1
        s = dy * width + dx
        tap = xbuf_ref[:, pad + s:pad + s + mb]
        if not (dy == 0 and dx == 0):
            tap = tap * masks_ref[t:t + 1, :]
        p1_ref[cin * t:cin * (t + 1), :] = tap
    hidden = jnp.dot(w1_ref[...], p1_ref[...], preferred_element_type=jnp.float32)
    hidden = jnp.maximum(hidden + beff_ref[...], 0.0)   # folded bias + sigma-conditioning

    # ---- stage hidden activations (interior fully overwritten every grid step) ----
    hbuf_ref[:, 0:pad] = jnp.zeros((cmid, pad), jnp.float32)
    hbuf_ref[:, pad + mb:2 * pad + mb] = jnp.zeros((cmid, pad), jnp.float32)
    hbuf_ref[:, pad:pad + mb] = hidden

    # ---- conv2: build im2col patch (9*Cmid, Mb) (sublane-aligned rows), ONE matmul ----
    for t in range(9):
        dy, dx = t // 3 - 1, t % 3 - 1
        s = dy * width + dx
        tap = hbuf_ref[:, pad + s:pad + s + mb]
        if not (dy == 0 and dx == 0):
            tap = tap * masks_ref[t:t + 1, :]
        p2_ref[cmid * t:cmid * (t + 1), :] = tap
    prior = jnp.dot(w2_ref[...], p2_ref[...], preferred_element_type=jnp.float32)
    prior = prior + b2_ref[...]

    # ---- fused PnP / RED combine, lane-dense unmasked store ----
    out_ref[...] = c_prior * prior + c_x * x + c_dc * dc


# -----------------------------------------------------------------------------
# Wrapper around pallas_call.
# -----------------------------------------------------------------------------
def _tap_masks(nt, h, w):
    """(9, nt*h*w) f32 validity masks for the 3x3 taps (zero outside each image)."""
    i = np.arange(h).reshape(h, 1)
    j = np.arange(w).reshape(1, w)
    rows = []
    for t in range(9):
        dy, dx = t // 3 - 1, t % 3 - 1
        ok = (i + dy >= 0) & (i + dy < h) & (j + dx >= 0) & (j + dx < w)
        rows.append(np.broadcast_to(ok, (nt, h, w)).reshape(-1))
    return np.stack(rows, axis=0).astype(np.float32)


def _pick_grid_steps(batch, hw_pixels):
    """Prefer >=2 grid steps (v7x megacore) with whole images per block while
    keeping per-step VMEM scratch small; blocks must stay lane-aligned."""
    scratch_per_image = hw_pixels * 1400          # ~bytes of VMEM scratch per image
    budget = 8 << 20
    min_steps = max(1, (batch * scratch_per_image + budget - 1) // budget)
    for s in range(max(2, int(min_steps)), batch + 1):
        if batch % s == 0 and ((batch // s) * hw_pixels) % 128 == 0:
            return s
    return 1                                       # single full-array block is always legal


def denoiser_update_pallas(x_flat, dc_flat, coeffs, mat_params, h, w, n_steps):
    """x_flat, dc_flat: (2, B*H*W) f32 -> fused x_hat (2, B*H*W) f32."""
    w1m, beff, w2m, b2c = mat_params
    cin, m_total = x_flat.shape
    cmid = w1m.shape[0]
    cout = w2m.shape[0]
    assert m_total % n_steps == 0
    mb = m_total // n_steps
    assert mb % (h * w) == 0
    assert n_steps == 1 or mb % 128 == 0
    nt = mb // (h * w)
    pad = ((w + 1 + 127) // 128) * 128            # aligned halo covering max tap offset

    masks = jnp.asarray(_tap_masks(nt, h, w))
    scal = jnp.asarray(coeffs, dtype=jnp.float32).reshape(1, 4)

    kernel = functools.partial(_dub_kernel, width=w, pad=pad)
    return pl.pallas_call(
        kernel,
        out_shape=jax.ShapeDtypeStruct((cout, m_total), jnp.float32),
        grid_spec=pltpu.PrefetchScalarGridSpec(
            num_scalar_prefetch=0,
            grid=(n_steps,),
            in_specs=[
                pl.BlockSpec(memory_space=pltpu.MemorySpace.SMEM),       # combine coeffs
                pl.BlockSpec((9, mb), lambda g: (0, 0)),                 # tap masks
                pl.BlockSpec((cin, mb), lambda g: (0, g)),               # x
                pl.BlockSpec((cin, mb), lambda g: (0, g)),               # dc
                pl.BlockSpec((cmid, 9 * cin), lambda g: (0, 0)),         # w1 (im2col)
                pl.BlockSpec((cmid, 1), lambda g: (0, 0)),               # b1 + sigma*semb
                pl.BlockSpec((cout, 9 * cmid), lambda g: (0, 0)),        # w2 (im2col)
                pl.BlockSpec((cout, 1), lambda g: (0, 0)),               # b2
            ],
            out_specs=pl.BlockSpec((cout, mb), lambda g: (0, g)),
            scratch_shapes=[
                pltpu.VMEM((cin, mb + 2 * pad), jnp.float32),            # xbuf
                pltpu.VMEM((cmid, mb + 2 * pad), jnp.float32),           # hbuf
                pltpu.VMEM((9 * cin, mb), jnp.float32),                  # p1
                pltpu.VMEM((9 * cmid, mb), jnp.float32),                 # p2
            ]),
        compiler_params=pltpu.CompilerParams(dimension_semantics=("parallel",)),
    )(scal, masks, x_flat, dc_flat, w1m, beff, w2m, b2c)


# -----------------------------------------------------------------------------
# DeepUnfoldingBlock.forward
# -----------------------------------------------------------------------------
def deep_unfolding_block_forward(x, y, smps, mask, net_params, config):
    method = config["method"]["deq_cal"]
    gamma = float(method["gamma"])
    alpha = float(method["alpha"])
    sigma = float(method["warmup"]["x_sigma"]) / 255.0
    mode = method["type"]

    b, h, w = x.shape

    # data-consistency term (FFT-based, XLA)
    dc = ftran(fmult(x, smps=smps, mask=mask) - y, smps=smps, mask=mask)

    # one generic fused update: out = c_p*net(x - g_in*dc) + c_x*x + c_dc*dc
    if mode == "pnp":
        coeffs = (gamma, alpha, 1.0 - alpha, -(1.0 - alpha) * gamma)
    elif mode == "red":
        coeffs = (0.0, gamma * alpha, 1.0 - gamma * alpha, -gamma)
    else:
        raise ValueError(mode)

    # pack weights into im2col matmul form, fold sigma conditioning into one bias
    w1, b1, semb, w2, b2 = net_params
    cmid = w1.shape[-1]
    cout = w2.shape[-1]
    w1m = jnp.transpose(w1, (3, 0, 1, 2)).reshape(cmid, -1).astype(jnp.float32)
    w2m = jnp.transpose(w2, (3, 0, 1, 2)).reshape(cout, -1).astype(jnp.float32)
    beff = (b1 + sigma * semb).reshape(cmid, 1).astype(jnp.float32)
    b2c = b2.reshape(cout, 1).astype(jnp.float32)

    # complex (B,H,W) -> lane-dense (2, B*H*W) real layout (view_as_real equivalent)
    def to_flat(z):
        return jnp.stack([jnp.real(z), jnp.imag(z)], axis=0).reshape(2, -1).astype(jnp.float32)

    x_flat = to_flat(x)
    dc_flat = to_flat(dc)

    n_steps = _pick_grid_steps(b, h * w)
    out_flat = denoiser_update_pallas(x_flat, dc_flat, coeffs,
                                      (w1m, beff, w2m, b2c), h, w, n_steps)

    out = out_flat.reshape(2, b, h, w)
    return out[0] + 1j * out[1]


# -----------------------------------------------------------------------------
# Pure-XLA reference (for correctness checking).
# -----------------------------------------------------------------------------
def _net_ref(xc, sigma, w1, b1, semb, w2, b2):
    zr = jnp.stack([jnp.real(xc), jnp.imag(xc)], axis=-1).astype(jnp.float32)
    dn = ("NHWC", "HWIO", "NHWC")
    hid = lax.conv_general_dilated(zr, w1, (1, 1), "SAME", dimension_numbers=dn)
    hid = jnp.maximum(hid + (b1 + sigma * semb).reshape(1, 1, 1, -1), 0.0)
    out = lax.conv_general_dilated(hid, w2, (1, 1), "SAME", dimension_numbers=dn)
    out = out + b2.reshape(1, 1, 1, -1)
    return out[..., 0] + 1j * out[..., 1]


def _block_ref(x, y, smps, mask, net_params, config):
    method = config["method"]["deq_cal"]
    gamma = method["gamma"]
    alpha = method["alpha"]
    sigma = method["warmup"]["x_sigma"] / 255.0
    dc = ftran(fmult(x, smps=smps, mask=mask) - y, smps=smps, mask=mask)
    if method["type"] == "pnp":
        xg = x - gamma * dc
        return alpha * _net_ref(xg, sigma, *net_params) + (1.0 - alpha) * xg
    return x - gamma * (dc + alpha * (x - _net_ref(x, sigma, *net_params)))


# -----------------------------------------------------------------------------
if __name__ == "__main__":
    B, NC, H, W = 2, 4, 16, 16
    CIN, CMID, COUT = 2, 32, 2

    config = {"method": {"deq_cal": {"gamma": 0.8, "alpha": 0.25, "type": "pnp",
                                     "warmup": {"x_sigma": 5.0}}}}

    key = jax.random.PRNGKey(0)
    ks = jax.random.split(key, 12)

    # deterministic synthetic denoiser parameters
    w1 = 0.1 * jax.random.normal(ks[0], (3, 3, CIN, CMID), dtype=jnp.float32)
    b1 = 0.01 * jax.random.normal(ks[1], (CMID,), dtype=jnp.float32)
    semb = 0.1 * jax.random.normal(ks[2], (CMID,), dtype=jnp.float32)
    w2 = 0.1 * jax.random.normal(ks[3], (3, 3, CMID, COUT), dtype=jnp.float32)
    b2 = 0.01 * jax.random.normal(ks[4], (COUT,), dtype=jnp.float32)
    net_params = (w1, b1, semb, w2, b2)

    # deterministic MRI problem: image, sensitivity maps, sampling mask, noisy k-space
    x = (jax.random.normal(ks[5], (B, H, W)) +
         1j * jax.random.normal(ks[6], (B, H, W))).astype(jnp.complex64)
    smps = (0.25 * (jax.random.normal(ks[7], (B, NC, H, W)) +
                    1j * jax.random.normal(ks[8], (B, NC, H, W)))).astype(jnp.complex64)
    mask = (jax.random.uniform(ks[9], (H, W)) > 0.4).astype(jnp.float32)
    noise = 0.05 * (jax.random.normal(ks[10], (B, NC, H, W)) +
                    1j * jax.random.normal(ks[11], (B, NC, H, W)))
    y = fmult(x, smps=smps, mask=mask) + mask * noise.astype(jnp.complex64)

    for mode in ("pnp", "red"):
        config["method"]["deq_cal"]["type"] = mode
        out = deep_unfolding_block_forward(x, y, smps, mask, net_params, config)
        out = jax.block_until_ready(out)
        ref = _block_ref(x, y, smps, mask, net_params, config)
        assert out.shape == (B, H, W) and out.dtype == jnp.complex64
        np.testing.assert_allclose(np.asarray(out), np.asarray(ref), rtol=2e-3, atol=2e-3)

    print("KERNEL_OK")
</pallas_src>

<mosaic_0001>
module attributes {stable_mosaic.version = 11 : i64} {
  func.func @_dub_kernel(%arg0: i32, %arg1: memref<1x4xf32, #tpu.memory_space<smem>>, %arg2: memref<9x256xf32, #tpu.memory_space<vmem>>, %arg3: memref<2x256xf32, #tpu.memory_space<vmem>>, %arg4: memref<2x256xf32, #tpu.memory_space<vmem>>, %arg5: memref<32x18xf32, #tpu.memory_space<vmem>>, %arg6: memref<32x1xf32, #tpu.memory_space<vmem>>, %arg7: memref<2x288xf32, #tpu.memory_space<vmem>>, %arg8: memref<2x1xf32, #tpu.memory_space<vmem>>, %arg9: memref<2x256xf32, #tpu.memory_space<vmem>>, %arg10: memref<2x512xf32, #tpu.memory_space<vmem>>, %arg11: memref<32x512xf32, #tpu.memory_space<vmem>>, %arg12: memref<18x256xf32, #tpu.memory_space<vmem>>, %arg13: memref<288x256xf32, #tpu.memory_space<vmem>>) attributes {dimension_semantics = [#tpu.dimension_semantics<parallel>], iteration_bounds = array<i64: 2>, scalar_prefetch = 0 : i64, scratch_operands = 4 : i64, tpu.core_type = #tpu.core_type<tc>, window_params = [{transform_indices = @transform_0, window_bounds = array<i64: 1, 4>}, {pipeline_mode = #tpu.pipeline_mode<synchronous>, transform_indices = @transform_1, window_bounds = array<i64: 9, 256>}, {transform_indices = @transform_2, window_bounds = array<i64: 2, 256>}, {transform_indices = @transform_3, window_bounds = array<i64: 2, 256>}, {pipeline_mode = #tpu.pipeline_mode<synchronous>, transform_indices = @transform_4, window_bounds = array<i64: 32, 18>}, {pipeline_mode = #tpu.pipeline_mode<synchronous>, transform_indices = @transform_5, window_bounds = array<i64: 32, 1>}, {pipeline_mode = #tpu.pipeline_mode<synchronous>, transform_indices = @transform_6, window_bounds = array<i64: 2, 288>}, {pipeline_mode = #tpu.pipeline_mode<synchronous>, transform_indices = @transform_7, window_bounds = array<i64: 2, 1>}, {transform_indices = @transform_8, window_bounds = array<i64: 2, 256>}]} {
    %c0 = arith.constant 0 : index
    %c0_0 = arith.constant 0 : index
    %0 = memref.load %arg1[%c0, %c0_0] : memref<1x4xf32, #tpu.memory_space<smem>>
    %c0_1 = arith.constant 0 : index
    %c1 = arith.constant 1 : index
    %1 = memref.load %arg1[%c0_1, %c1] : memref<1x4xf32, #tpu.memory_space<smem>>
    %c0_2 = arith.constant 0 : index
    %c2 = arith.constant 2 : index
    %2 = memref.load %arg1[%c0_2, %c2] : memref<1x4xf32, #tpu.memory_space<smem>>
    %c0_3 = arith.constant 0 : index
    %c3 = arith.constant 3 : index
    %3 = memref.load %arg1[%c0_3, %c3] : memref<1x4xf32, #tpu.memory_space<smem>>
    %c0_4 = arith.constant 0 : index
    %c0_5 = arith.constant 0 : index
    %4 = vector.load %arg3[%c0_4, %c0_5] : memref<2x256xf32, #tpu.memory_space<vmem>>, vector<2x256xf32>
    %c0_6 = arith.constant 0 : index
    %c0_7 = arith.constant 0 : index
    %5 = vector.load %arg4[%c0_6, %c0_7] : memref<2x256xf32, #tpu.memory_space<vmem>>, vector<2x256xf32>
    %6 = vector.broadcast %0 : f32 to vector<2x256xf32>
    %7 = arith.mulf %6, %5 : vector<2x256xf32>
    %8 = arith.subf %4, %7 : vector<2x256xf32>
    %cst = arith.constant 0.000000e+00 : f32
    %9 = vector.broadcast %cst : f32 to vector<2x128xf32>
    %c0_8 = arith.constant 0 : index
    %c0_9 = arith.constant 0 : index
    %10 = vector.load %arg10[%c0_8, %c0_9] : memref<2x512xf32, #tpu.memory_space<vmem>>, vector<2x128xf32>
    tpu.vector_store %arg10[%c0_8, %c0_9], %9 {strides = array<i32>} : memref<2x512xf32, #tpu.memory_space<vmem>>, vector<2x128xf32>,
    %cst_10 = arith.constant 0.000000e+00 : f32
    %11 = vector.broadcast %cst_10 : f32 to vector<2x128xf32>
    %c0_11 = arith.constant 0 : index
    %c384 = arith.constant 384 : index
    %12 = vector.load %arg10[%c0_11, %c384] : memref<2x512xf32, #tpu.memory_space<vmem>>, vector<2x128xf32>
    tpu.vector_store %arg10[%c0_11, %c384], %11 {strides = array<i32>} : memref<2x512xf32, #tpu.memory_space<vmem>>, vector<2x128xf32>,
    %c0_12 = arith.constant 0 : index
    %c128 = arith.constant 128 : index
    %13 = vector.load %arg10[%c0_12, %c128] : memref<2x512xf32, #tpu.memory_space<vmem>>, vector<2x256xf32>
    tpu.vector_store %arg10[%c0_12, %c128], %8 {strides = array<i32>} : memref<2x512xf32, #tpu.memory_space<vmem>>, vector<2x256xf32>,
    %c0_13 = arith.constant 0 : index
    %c111 = arith.constant 111 : index
    %14 = vector.load %arg10[%c0_13, %c111] : memref<2x512xf32, #tpu.memory_space<vmem>>, vector<2x256xf32>
    %c0_14 = arith.constant 0 : index
    %c0_15 = arith.constant 0 : index
    %15 = vector.load %arg2[%c0_14, %c0_15] : memref<9x256xf32, #tpu.memory_space<vmem>>, vector<1x256xf32>
    %16 = vector.broadcast %15 : vector<1x256xf32> to vector<2x256xf32>
    %17 = arith.mulf %14, %16 : vector<2x256xf32>
    %c0_16 = arith.constant 0 : index
    %c0_17 = arith.constant 0 : index
    %18 = vector.load %arg12[%c0_16, %c0_17] : memref<18x256xf32, #tpu.memory_space<vmem>>, vector<2x256xf32>
    tpu.vector_store %arg12[%c0_16, %c0_17], %17 {strides = array<i32>} : memref<18x256xf32, #tpu.memory_space<vmem>>, vector<2x256xf32>,
    %c0_18 = arith.constant 0 : index
    %c112 = arith.constant 112 : index
    %19 = vector.load %arg10[%c0_18, %c112] : memref<2x512xf32, #tpu.memory_space<vmem>>, vector<2x256xf32>
    %c1_19 = arith.constant 1 : index
    %c0_20 = arith.constant 0 : index
    %20 = vector.load %arg2[%c1_19, %c0_20] : memref<9x256xf32, #tpu.memory_space<vmem>>, vector<1x256xf32>
    %21 = vector.broadcast %20 : vector<1x256xf32> to vector<2x256xf32>
    %22 = arith.mulf %19, %21 : vector<2x256xf32>
    %c2_21 = arith.constant 2 : index
    %c0_22 = arith.constant 0 : index
    %23 = vector.load %arg12[%c2_21, %c0_22] : memref<18x256xf32, #tpu.memory_space<vmem>>, vector<2x256xf32>
    tpu.vector_store %arg12[%c2_21, %c0_22], %22 {strides = array<i32>} : memref<18x256xf32, #tpu.memory_space<vmem>>, vector<2x256xf32>,
    %c0_23 = arith.constant 0 : index
    %c113 = arith.constant 113 : index
    %24 = vector.load %arg10[%c0_23, %c113] : memref<2x512xf32, #tpu.memory_space<vmem>>, vector<2x256xf32>
    %c2_24 = arith.constant 2 : index
    %c0_25 = arith.constant 0 : index
    %25 = vector.load %arg2[%c2_24, %c0_25] : memref<9x256xf32, #tpu.memory_space<vmem>>, vector<1x256xf32>
    %26 = vector.broadcast %25 : vector<1x256xf32> to vector<2x256xf32>
    %27 = arith.mulf %24, %26 : vector<2x256xf32>
    %c4 = arith.constant 4 : index
    %c0_26 = arith.constant 0 : index
    %28 = vector.load %arg12[%c4, %c0_26] : memref<18x256xf32, #tpu.memory_space<vmem>>, vector<2x256xf32>
    tpu.vector_store %arg12[%c4, %c0_26], %27 {strides = array<i32>} : memref<18x256xf32, #tpu.memory_space<vmem>>, vector<2x256xf32>,
    %c0_27 = arith.constant 0 : index
    %c127 = arith.constant 127 : index
    %29 = vector.load %arg10[%c0_27, %c127] : memref<2x512xf32, #tpu.memory_space<vmem>>, vector<2x256xf32>
    %c3_28 = arith.constant 3 : index
    %c0_29 = arith.constant 0 : index
    %30 = vector.load %arg2[%c3_28, %c0_29] : memref<9x256xf32, #tpu.memory_space<vmem>>, vector<1x256xf32>
    %31 = vector.broadcast %30 : vector<1x256xf32> to vector<2x256xf32>
    %32 = arith.mulf %29, %31 : vector<2x256xf32>
    %c6 = arith.constant 6 : index
    %c0_30 = arith.constant 0 : index
    %33 = vector.load %arg12[%c6, %c0_30] : memref<18x256xf32, #tpu.memory_space<vmem>>, vector<2x256xf32>
    tpu.vector_store %arg12[%c6, %c0_30], %32 {strides = array<i32>} : memref<18x256xf32, #tpu.memory_space<vmem>>, vector<2x256xf32>,
    %c0_31 = arith.constant 0 : index
    %c128_32 = arith.constant 128 : index
    %34 = vector.load %arg10[%c0_31, %c128_32] : memref<2x512xf32, #tpu.memory_space<vmem>>, vector<2x256xf32>
    %c8 = arith.constant 8 : index
    %c0_33 = arith.constant 0 : index
    %35 = vector.load %arg12[%c8, %c0_33] : memref<18x256xf32, #tpu.memory_space<vmem>>, vector<2x256xf32>
    tpu.vector_store %arg12[%c8, %c0_33], %34 {strides = array<i32>} : memref<18x256xf32, #tpu.memory_space<vmem>>, vector<2x256xf32>,
    %c0_34 = arith.constant 0 : index
    %c129 = arith.constant 129 : index
    %36 = vector.load %arg10[%c0_34, %c129] : memref<2x512xf32, #tpu.memory_space<vmem>>, vector<2x256xf32>
    %c5 = arith.constant 5 : index
    %c0_35 = arith.constant 0 : index
    %37 = vector.load %arg2[%c5, %c0_35] : memref<9x256xf32, #tpu.memory_space<vmem>>, vector<1x256xf32>
    %38 = vector.broadcast %37 : vector<1x256xf32> to vector<2x256xf32>
    %39 = arith.mulf %36, %38 : vector<2x256xf32>
    %c10 = arith.constant 10 : index
    %c0_36 = arith.constant 0 : index
    %40 = vector.load %arg12[%c10, %c0_36] : memref<18x256xf32, #tpu.memory_space<vmem>>, vector<2x256xf32>
    tpu.vector_store %arg12[%c10, %c0_36], %39 {strides = array<i32>} : memref<18x256xf32, #tpu.memory_space<vmem>>, vector<2x256xf32>,
    %c0_37 = arith.constant 0 : index
    %c143 = arith.constant 143 : index
    %41 = vector.load %arg10[%c0_37, %c143] : memref<2x512xf32, #tpu.memory_space<vmem>>, vector<2x256xf32>
    %c6_38 = arith.constant 6 : index
    %c0_39 = arith.constant 0 : index
    %42 = vector.load %arg2[%c6_38, %c0_39] : memref<9x256xf32, #tpu.memory_space<vmem>>, vector<1x256xf32>
    %43 = vector.broadcast %42 : vector<1x256xf32> to vector<2x256xf32>
    %44 = arith.mulf %41, %43 : vector<2x256xf32>
    %c12 = arith.constant 12 : index
    %c0_40 = arith.constant 0 : index
    %45 = vector.load %arg12[%c12, %c0_40] : memref<18x256xf32, #tpu.memory_space<vmem>>, vector<2x256xf32>
    tpu.vector_store %arg12[%c12, %c0_40], %44 {strides = array<i32>} : memref<18x256xf32, #tpu.memory_space<vmem>>, vector<2x256xf32>,
    %c0_41 = arith.constant 0 : index
    %c144 = arith.constant 144 : index
    %46 = vector.load %arg10[%c0_41, %c144] : memref<2x512xf32, #tpu.memory_space<vmem>>, vector<2x256xf32>
    %c7 = arith.constant 7 : index
    %c0_42 = arith.constant 0 : index
    %47 = vector.load %arg2[%c7, %c0_42] : memref<9x256xf32, #tpu.memory_space<vmem>>, vector<1x256xf32>
    %48 = vector.broadcast %47 : vector<1x256xf32> to vector<2x256xf32>
    %49 = arith.mulf %46, %48 : vector<2x256xf32>
    %c14 = arith.constant 14 : index
    %c0_43 = arith.constant 0 : index
    %50 = vector.load %arg12[%c14, %c0_43] : memref<18x256xf32, #tpu.memory_space<vmem>>, vector<2x256xf32>
    tpu.vector_store %arg12[%c14, %c0_43], %49 {strides = array<i32>} : memref<18x256xf32, #tpu.memory_space<vmem>>, vector<2x256xf32>,
    %c0_44 = arith.constant 0 : index
    %c145 = arith.constant 145 : index
    %51 = vector.load %arg10[%c0_44, %c145] : memref<2x512xf32, #tpu.memory_space<vmem>>, vector<2x256xf32>
    %c8_45 = arith.constant 8 : index
    %c0_46 = arith.constant 0 : index
    %52 = vector.load %arg2[%c8_45, %c0_46] : memref<9x256xf32, #tpu.memory_space<vmem>>, vector<1x256xf32>
    %53 = vector.broadcast %52 : vector<1x256xf32> to vector<2x256xf32>
    %54 = arith.mulf %51, %53 : vector<2x256xf32>
    %c16 = arith.constant 16 : index
    %c0_47 = arith.constant 0 : index
    %55 = vector.load %arg12[%c16, %c0_47] : memref<18x256xf32, #tpu.memory_space<vmem>>, vector<2x256xf32>
    tpu.vector_store %arg12[%c16, %c0_47], %54 {strides = array<i32>} : memref<18x256xf32, #tpu.memory_space<vmem>>, vector<2x256xf32>,
    %c0_48 = arith.constant 0 : index
    %c0_49 = arith.constant 0 : index
    %56 = vector.load %arg5[%c0_48, %c0_49] : memref<32x18xf32, #tpu.memory_space<vmem>>, vector<32x18xf32>
    %c0_50 = arith.constant 0 : index
    %c0_51 = arith.constant 0 : index
    %57 = vector.load %arg12[%c0_50, %c0_51] : memref<18x256xf32, #tpu.memory_space<vmem>>, vector<18x256xf32>
    %cst_52 = arith.constant dense<0.000000e+00> : vector<32x256xf32>
    %58 = tpu.matmul %56, %57, %cst_52 {dimension_numbers = #tpu.dot_dimension_numbers<[1], [0], [0], [1], [0, 0, 1, 1], [], []>} : vector<32x18xf32>, vector<18x256xf32>, vector<32x256xf32> -> vector<32x256xf32>
    %c0_53 = arith.constant 0 : index
    %c0_54 = arith.constant 0 : index
    %59 = vector.load %arg6[%c0_53, %c0_54] : memref<32x1xf32, #tpu.memory_space<vmem>>, vector<32x1xf32>
    %60 = vector.broadcast %59 : vector<32x1xf32> to vector<32x256xf32>
    %61 = arith.addf %58, %60 : vector<32x256xf32>
    %cst_55 = arith.constant 0.000000e+00 : f32
    %62 = vector.broadcast %cst_55 : f32 to vector<32x256xf32>
    %63 = arith.maximumf %61, %62 : vector<32x256xf32>
    %cst_56 = arith.constant 0.000000e+00 : f32
    %64 = vector.broadcast %cst_56 : f32 to vector<32x128xf32>
    %c0_57 = arith.constant 0 : index
    %c0_58 = arith.constant 0 : index
    %65 = vector.load %arg11[%c0_57, %c0_58] : memref<32x512xf32, #tpu.memory_space<vmem>>, vector<32x128xf32>
    tpu.vector_store %arg11[%c0_57, %c0_58], %64 {strides = array<i32>} : memref<32x512xf32, #tpu.memory_space<vmem>>, vector<32x128xf32>,
    %cst_59 = arith.constant 0.000000e+00 : f32
    %66 = vector.broadcast %cst_59 : f32 to vector<32x128xf32>
    %c0_60 = arith.constant 0 : index
    %c384_61 = arith.constant 384 : index
    %67 = vector.load %arg11[%c0_60, %c384_61] : memref<32x512xf32, #tpu.memory_space<vmem>>, vector<32x128xf32>
    tpu.vector_store %arg11[%c0_60, %c384_61], %66 {strides = array<i32>} : memref<32x512xf32, #tpu.memory_space<vmem>>, vector<32x128xf32>,
    %c0_62 = arith.constant 0 : index
    %c128_63 = arith.constant 128 : index
    %68 = vector.load %arg11[%c0_62, %c128_63] : memref<32x512xf32, #tpu.memory_space<vmem>>, vector<32x256xf32>
    tpu.vector_store %arg11[%c0_62, %c128_63], %63 {strides = array<i32>} : memref<32x512xf32, #tpu.memory_space<vmem>>, vector<32x256xf32>,
    %c0_64 = arith.constant 0 : index
    %c111_65 = arith.constant 111 : index
    %69 = vector.load %arg11[%c0_64, %c111_65] : memref<32x512xf32, #tpu.memory_space<vmem>>, vector<32x256xf32>
    %c0_66 = arith.constant 0 : index
    %c0_67 = arith.constant 0 : index
    %70 = vector.load %arg2[%c0_66, %c0_67] : memref<9x256xf32, #tpu.memory_space<vmem>>, vector<1x256xf32>
    %71 = vector.broadcast %70 : vector<1x256xf32> to vector<32x256xf32>
    %72 = arith.mulf %69, %71 : vector<32x256xf32>
    %c0_68 = arith.constant 0 : index
    %c0_69 = arith.constant 0 : index
    %73 = vector.load %arg13[%c0_68, %c0_69] : memref<288x256xf32, #tpu.memory_space<vmem>>, vector<32x256xf32>
    tpu.vector_store %arg13[%c0_68, %c0_69], %72 {strides = array<i32>} : memref<288x256xf32, #tpu.memory_space<vmem>>, vector<32x256xf32>,
    %c0_70 = arith.constant 0 : index
    %c112_71 = arith.constant 112 : index
    %74 = vector.load %arg11[%c0_70, %c112_71] : memref<32x512xf32, #tpu.memory_space<vmem>>, vector<32x256xf32>
    %c1_72 = arith.constant 1 : index
    %c0_73 = arith.constant 0 : index
    %75 = vector.load %arg2[%c1_72, %c0_73] : memref<9x256xf32, #tpu.memory_space<vmem>>, vector<1x256xf32>
    %76 = vector.broadcast %75 : vector<1x256xf32> to vector<32x256xf32>
    %77 = arith.mulf %74, %76 : vector<32x256xf32>
    %c32 = arith.constant 32 : index
    %c0_74 = arith.constant 0 : index
    %78 = vector.load %arg13[%c32, %c0_74] : memref<288x256xf32, #tpu.memory_space<vmem>>, vector<32x256xf32>
    tpu.vector_store %arg13[%c32, %c0_74], %77 {strides = array<i32>} : memref<288x256xf32, #tpu.memory_space<vmem>>, vector<32x256xf32>,
    %c0_75 = arith.constant 0 : index
    %c113_76 = arith.constant 113 : index
    %79 = vector.load %arg11[%c0_75, %c113_76] : memref<32x512xf32, #tpu.memory_space<vmem>>, vector<32x256xf32>
    %c2_77 = arith.constant 2 : index
    %c0_78 = arith.constant 0 : index
    %80 = vector.load %arg2[%c2_77, %c0_78] : memref<9x256xf32, #tpu.memory_space<vmem>>, vector<1x256xf32>
    %81 = vector.broadcast %80 : vector<1x256xf32> to vector<32x256xf32>
    %82 = arith.mulf %79, %81 : vector<32x256xf32>
    %c64 = arith.constant 64 : index
    %c0_79 = arith.constant 0 : index
    %83 = vector.load %arg13[%c64, %c0_79] : memref<288x256xf32, #tpu.memory_space<vmem>>, vector<32x256xf32>
    tpu.vector_store %arg13[%c64, %c0_79], %82 {strides = array<i32>} : memref<288x256xf32, #tpu.memory_space<vmem>>, vector<32x256xf32>,
    %c0_80 = arith.constant 0 : index
    %c127_81 = arith.constant 127 : index
    %84 = vector.load %arg11[%c0_80, %c127_81] : memref<32x512xf32, #tpu.memory_space<vmem>>, vector<32x256xf32>
    %c3_82 = arith.constant 3 : index
    %c0_83 = arith.constant 0 : index
    %85 = vector.load %arg2[%c3_82, %c0_83] : memref<9x256xf32, #tpu.memory_space<vmem>>, vector<1x256xf32>
    %86 = vector.broadcast %85 : vector<1x256xf32> to vector<32x256xf32>
    %87 = arith.mulf %84, %86 : vector<32x256xf32>
    %c96 = arith.constant 96 : index
    %c0_84 = arith.constant 0 : index
    %88 = vector.load %arg13[%c96, %c0_84] : memref<288x256xf32, #tpu.memory_space<vmem>>, vector<32x256xf32>
    tpu.vector_store %arg13[%c96, %c0_84], %87 {strides = array<i32>} : memref<288x256xf32, #tpu.memory_space<vmem>>, vector<32x256xf32>,
    %c0_85 = arith.constant 0 : index
    %c128_86 = arith.constant 128 : index
    %89 = vector.load %arg11[%c0_85, %c128_86] : memref<32x512xf32, #tpu.memory_space<vmem>>, vector<32x256xf32>
    %c128_87 = arith.constant 128 : index
    %c0_88 = arith.constant 0 : index
    %90 = vector.load %arg13[%c128_87, %c0_88] : memref<288x256xf32, #tpu.memory_space<vmem>>, vector<32x256xf32>
    tpu.vector_store %arg13[%c128_87, %c0_88], %89 {strides = array<i32>} : memref<288x256xf32, #tpu.memory_space<vmem>>, vector<32x256xf32>,
    %c0_89 = arith.constant 0 : index
    %c129_90 = arith.constant 129 : index
    %91 = vector.load %arg11[%c0_89, %c129_90] : memref<32x512xf32, #tpu.memory_space<vmem>>, vector<32x256xf32>
    %c5_91 = arith.constant 5 : index
    %c0_92 = arith.constant 0 : index
    %92 = vector.load %arg2[%c5_91, %c0_92] : memref<9x256xf32, #tpu.memory_space<vmem>>, vector<1x256xf32>
    %93 = vector.broadcast %92 : vector<1x256xf32> to vector<32x256xf32>
    %94 = arith.mulf %91, %93 : vector<32x256xf32>
    %c160 = arith.constant 160 : index
    %c0_93 = arith.constant 0 : index
    %95 = vector.load %arg13[%c160, %c0_93] : memref<288x256xf32, #tpu.memory_space<vmem>>, vector<32x256xf32>
    tpu.vector_store %arg13[%c160, %c0_93], %94 {strides = array<i32>} : memref<288x256xf32, #tpu.memory_space<vmem>>, vector<32x256xf32>,
    %c0_94 = arith.constant 0 : index
    %c143_95 = arith.constant 143 : index
    %96 = vector.load %arg11[%c0_94, %c143_95] : memref<32x512xf32, #tpu.memory_space<vmem>>, vector<32x256xf32>
    %c6_96 = arith.constant 6 : index
    %c0_97 = arith.constant 0 : index
    %97 = vector.load %arg2[%c6_96, %c0_97] : memref<9x256xf32, #tpu.memory_space<vmem>>, vector<1x256xf32>
    %98 = vector.broadcast %97 : vector<1x256xf32> to vector<32x256xf32>
    %99 = arith.mulf %96, %98 : vector<32x256xf32>
    %c192 = arith.constant 192 : index
    %c0_98 = arith.constant 0 : index
    %100 = vector.load %arg13[%c192, %c0_98] : memref<288x256xf32, #tpu.memory_space<vmem>>, vector<32x256xf32>
    tpu.vector_store %arg13[%c192, %c0_98], %99 {strides = array<i32>} : memref<288x256xf32, #tpu.memory_space<vmem>>, vector<32x256xf32>,
    %c0_99 = arith.constant 0 : index
    %c144_100 = arith.constant 144 : index
    %101 = vector.load %arg11[%c0_99, %c144_100] : memref<32x512xf32, #tpu.memory_space<vmem>>, vector<32x256xf32>
    %c7_101 = arith.constant 7 : index
    %c0_102 = arith.constant 0 : index
    %102 = vector.load %arg2[%c7_101, %c0_102] : memref<9x256xf32, #tpu.memory_space<vmem>>, vector<1x256xf32>
    %103 = vector.broadcast %102 : vector<1x256xf32> to vector<32x256xf32>
    %104 = arith.mulf %101, %103 : vector<32x256xf32>
    %c224 = arith.constant 224 : index
    %c0_103 = arith.constant 0 : index
    %105 = vector.load %arg13[%c224, %c0_103] : memref<288x256xf32, #tpu.memory_space<vmem>>, vector<32x256xf32>
    tpu.vector_store %arg13[%c224, %c0_103], %104 {strides = array<i32>} : memref<288x256xf32, #tpu.memory_space<vmem>>, vector<32x256xf32>,
    %c0_104 = arith.constant 0 : index
    %c145_105 = arith.constant 145 : index
    %106 = vector.load %arg11[%c0_104, %c145_105] : memref<32x512xf32, #tpu.memory_space<vmem>>, vector<32x256xf32>
    %c8_106 = arith.constant 8 : index
    %c0_107 = arith.constant 0 : index
    %107 = vector.load %arg2[%c8_106, %c0_107] : memref<9x256xf32, #tpu.memory_space<vmem>>, vector<1x256xf32>
    %108 = vector.broadcast %107 : vector<1x256xf32> to vector<32x256xf32>
    %109 = arith.mulf %106, %108 : vector<32x256xf32>
    %c256 = arith.constant 256 : index
    %c0_108 = arith.constant 0 : index
    %110 = vector.load %arg13[%c256, %c0_108] : memref<288x256xf32, #tpu.memory_space<vmem>>, vector<32x256xf32>
    tpu.vector_store %arg13[%c256, %c0_108], %109 {strides = array<i32>} : memref<288x256xf32, #tpu.memory_space<vmem>>, vector<32x256xf32>,
    %c0_109 = arith.constant 0 : index
    %c0_110 = arith.constant 0 : index
    %111 = vector.load %arg7[%c0_109, %c0_110] : memref<2x288xf32, #tpu.memory_space<vmem>>, vector<2x288xf32>
    %c0_111 = arith.constant 0 : index
    %c0_112 = arith.constant 0 : index
    %112 = vector.load %arg13[%c0_111, %c0_112] : memref<288x256xf32, #tpu.memory_space<vmem>>, vector<288x256xf32>
    %cst_113 = arith.constant dense<0.000000e+00> : vector<2x256xf32>
    %113 = tpu.matmul %111, %112, %cst_113 {dimension_numbers = #tpu.dot_dimension_numbers<[1], [0], [0], [1], [0, 0, 1, 1], [], []>} : vector<2x288xf32>, vector<288x256xf32>, vector<2x256xf32> -> vector<2x256xf32>
    %c0_114 = arith.constant 0 : index
    %c0_115 = arith.constant 0 : index
    %114 = vector.load %arg8[%c0_114, %c0_115] : memref<2x1xf32, #tpu.memory_space<vmem>>, vector<2x1xf32>
    %115 = vector.broadcast %114 : vector<2x1xf32> to vector<2x256xf32>
    %116 = arith.addf %113, %115 : vector<2x256xf32>
    %117 = vector.broadcast %1 : f32 to vector<2x256xf32>
    %118 = arith.mulf %117, %116 : vector<2x256xf32>
    %119 = vector.broadcast %2 : f32 to vector<2x256xf32>
    %120 = arith.mulf %119, %4 : vector<2x256xf32>
    %121 = arith.addf %118, %120 : vector<2x256xf32>
    %122 = vector.broadcast %3 : f32 to vector<2x256xf32>
    %123 = arith.mulf %122, %5 : vector<2x256xf32>
    %124 = arith.addf %121, %123 : vector<2x256xf32>
    %c0_116 = arith.constant 0 : index
    %c0_117 = arith.constant 0 : index
    %125 = vector.load %arg9[%c0_116, %c0_117] : memref<2x256xf32, #tpu.memory_space<vmem>>, vector<2x256xf32>
    tpu.vector_store %arg9[%c0_116, %c0_117], %124 {strides = array<i32>} : memref<2x256xf32, #tpu.memory_space<vmem>>, vector<2x256xf32>,
    return
  }
  func.func @transform_0(%arg0: i32) -> (i32, i32) {
    %c0_i32 = arith.constant 0 : i32
    %c0_i32_0 = arith.constant 0 : i32
    %c0_i32_1 = arith.constant 0 : i32
    return %c0_i32, %c0_i32_0 : i32, i32
  }
  func.func @transform_1(%arg0: i32) -> (i32, i32) {
    %c0_i32 = arith.constant 0 : i32
    %c0_i32_0 = arith.constant 0 : i32
    %c0_i32_1 = arith.constant 0 : i32
    return %c0_i32, %c0_i32_0 : i32, i32
  }
  func.func @transform_2(%arg0: i32) -> (i32, i32) {
    %c0_i32 = arith.constant 0 : i32
    %c0_i32_0 = arith.constant 0 : i32
    return %c0_i32, %arg0 : i32, i32
  }
  func.func @transform_3(%arg0: i32) -> (i32, i32) {
    %c0_i32 = arith.constant 0 : i32
    %c0_i32_0 = arith.constant 0 : i32
    return %c0_i32, %arg0 : i32, i32
  }
  func.func @transform_4(%arg0: i32) -> (i32, i32) {
    %c0_i32 = arith.constant 0 : i32
    %c0_i32_0 = arith.constant 0 : i32
    %c0_i32_1 = arith.constant 0 : i32
    return %c0_i32, %c0_i32_0 : i32, i32
  }
  func.func @transform_5(%arg0: i32) -> (i32, i32) {
    %c0_i32 = arith.constant 0 : i32
    %c0_i32_0 = arith.constant 0 : i32
    %c0_i32_1 = arith.constant 0 : i32
    return %c0_i32, %c0_i32_0 : i32, i32
  }
  func.func @transform_6(%arg0: i32) -> (i32, i32) {
    %c0_i32 = arith.constant 0 : i32
    %c0_i32_0 = arith.constant 0 : i32
    %c0_i32_1 = arith.constant 0 : i32
    return %c0_i32, %c0_i32_0 : i32, i32
  }
  func.func @transform_7(%arg0: i32) -> (i32, i32) {
    %c0_i32 = arith.constant 0 : i32
    %c0_i32_0 = arith.constant 0 : i32
    %c0_i32_1 = arith.constant 0 : i32
    return %c0_i32, %c0_i32_0 : i32, i32
  }
  func.func @transform_8(%arg0: i32) -> (i32, i32) {
    %c0_i32 = arith.constant 0 : i32
    %c0_i32_0 = arith.constant 0 : i32
    return %c0_i32, %arg0 : i32, i32
  }
}

</mosaic_0001>

<bundles_post_ra>
// kernel: tpu_custom_call.1
= control target key start
LH: loop header
LB: loop body
LE: loop exit
PB: predicated region body
PF: predicated region fallthrough
CT: control target
= control target key end

     0   :  { %s3571_s0 = inlined_call_operand.vmem [shape: f32[1,4], index: 0, kind: input, shape index: {}]   ;;  %s3572_s1 = inlined_call_operand.vmem [shape: f32[9,256], index: 1, kind: input, shape index: {}]   ;;  %s3573_s2 = inlined_call_operand.vmem [shape: f32[2,512], index: 2, kind: input, shape index: {}]   ;;  %s3574_s3 = inlined_call_operand.vmem [shape: f32[2,512], index: 3, kind: input, shape index: {}]   ;;  %s3575_s4 = inlined_call_operand.vmem [shape: f32[32,18], index: 4, kind: input, shape index: {}]   ;;  %s3576_s5 = inlined_call_operand.vmem [shape: f32[32,1], index: 5, kind: input, shape index: {}]   ;;  %s3577_s6 = inlined_call_operand.vmem [shape: f32[2,288], index: 6, kind: input, shape index: {}]   ;;  %s3578_s7 = inlined_call_operand.vmem [shape: f32[2,1], index: 7, kind: input, shape index: {}]   ;;  %s3579_s8 = inlined_call_operand.hbm [shape: f32[2,512], index: 8, kind: output, shape index: {}]  }
   0x1   :  { %3596 = sst [smem:[#allocation12_spill]] %s3571_s0 }
   0x2   :  { %13 = vsyncpa [#allocation8], 0 }
   0x3   :  { %14 = vsyncpa [#allocation7], 0 }
   0x4   :  { %16 = vsyncpa [#allocation7 + $0x1], 0  ;;  %s2775_s27 = smov 0   ;;  %s2777_s28 = smov 0  }
   0x5   :  { %s2779_s29 = smov 0   ;;  %s2781_s30 = smov 0  }
   0x6 LB: > { %s2796_s9 = sadd.s32 4294967295, %s2715_s30   ;;  %s2205_s10 = sadd.s32 4294967294, %s2715_s30   ;;  %s2715_s30 = sphi %s2781_s30, %s3612_s30   ;;  %s2711_s29 = sphi %s2779_s29, %s3611_s29   ;;  %s2707_s28 = sphi %s2777_s28, %s3610_s28   ;;  %s2703_s27 = sphi %s2775_s27, %s3609_s27  }
   0x7   : > { %s2800_s11 = sadd.s32 1, %s2715_s30   ;;  %s207_s12 = sadd.s32 1, %s2711_s29 }
   0x8   : > { %s204_s13 = ssub.s32 %s2715_s30, %s2800_s11  ;;  %p217_p0 = scmp.ne.s32.totalorder %s2711_s29, %s2707_s28 }
   0x9   : > { %p205_p1 = scmp.eq.s32.totalorder %s204_s13, 0  ;;  %p218_p2 = scmp.eq.s32.totalorder %s2796_s9, 1 }
   0xa   : > { %p223_p3 = scmp.ne.s32.totalorder %s2707_s28, %s2703_s27  ;;  %p224_p4 = scmp.eq.s32.totalorder %s2205_s10, 1 }
   0xb   : > { %s2811_s14 = scalar_select %p205_p1, %s2711_s29, %s207_s12  }
   0xc   : > { %p2813_p5 = por %p218_p2, %p217_p0  ;;  %p2817_p6 = por %p224_p4, %p223_p3 }
   0xd   : > { %p2206_p7 = scmp.ge.s32.totalorder %s2715_s30, 1  ;;  %p231_p8 = scmp.lt.s32.totalorder %s2715_s30, 3 }
   0xe   : > { %p2342_p9 = scmp.eq.s32.totalorder %s2796_s9, 0  ;;  %s3600_s0 = sld [smem:[#allocation12_spill]] }
   0xf   : > { %p2824_p10 = pnand %p2206_p7, %p231_p8 }
  0x11   : > { %p2334_p11 = pneg %p2824_p10 }
  0x13   : > { %p2335_p12 = pnand %p2342_p9, %p2334_p11 }
  0x14   : > { %s244_s20 = sshll.u32 %s3600_s0, 4  ;;  %s245_s20 = int_to_ptr.vmem [resolvable:$true] %s244_s20 }
  0x15   : > { %s2634_s21 = scalar_lea.vmem %s245_s20, 16  ;;  %p2636_p0 = pneg %p2335_p12 }
  0x16   : > { %p2635_p13 = scmp.ne.s32.totalorder %s245_s20, %s2634_s21  ;;  %p2642_p3 = scmp.lt.s32.totalorder %s245_s20, %s245_s20 }
  0x17   : > { %p2643_p4 = scmp.lt.s32.totalorder %s2634_s21, %s2634_s21 }
  0x18   : > { %p2637_p1 = pnand %p2636_p0, %p2635_p13 }
  0x19   : > { %p2644_p7 = por %p2643_p4, %p2642_p3 }
  0x1a   : > { %p2638_p2 = pneg %p2637_p1 }
  0x1c   : > { %p2645_p8 = pnand %p2644_p7, %p2638_p2 }
  0x1e   : > { %2648 = shalt.err (!%p2645_p8)
}
  0x1f   : > { %s2717_s22 = smov [#allocation6]   ;;  %290 = sbr.rel (%p2824_p10) target bundleno = 1011 (0x3f3), region = 52 }
  0x20   : > { %2337 = dma.vmem_to_smem (!%p2335_p12), %s245_s20, 16, %s2717_s22, [#allocation8]  }
  0x26   : > { %2694 = dma.done.wait (%p2342_p9), [#allocation8], 16  }
  0x27   : > { %2696 = vsyncadd (%p2342_p9), [#allocation8], 4294967280 }
  0x28   : > { %296 = sfence }
  0x29   : > { %v358_v0 = vlaneseq  ;;  %v2718_v1 = vmov 1983009808   ;;  %v2219_v4 = vld [vmem:[%s3572_s1 + $0x1] ss:$8 sm:$0x3]  ;;  %s2212_s22 = sshll.u32 %s2796_s9, 1 }
  0x2a   : > { %v368_v2 = vunpack.c.l.s4 %v2718_v1  ;;  %v2223_v6 = vld [vmem:[%s3572_s1 + $0x5] ss:$8 sm:$0x3]  ;;  %v2220_v7 = vld [vmem:[%s3572_s1 + $0x2] ss:$8 sm:$0x3] }
  0x2b   : > { %v359_v3 = vshrl.u32 %v358_v0, 7  ;;  %v2224_v10 = vld [vmem:[%s3572_s1 + $0x6] ss:$8 sm:$0x3]  ;;  %s2870_s23 = sld [smem:[#allocation6]]  ;;  %v2719_v18 = vmov 0.0  }
  0x2c   : > { %v369_v5 = vunpack.c.0.s8 %v368_v2  ;;  %v2221_v12 = vld [vmem:[%s3572_s1 + $0x3] ss:$8 sm:$0x3]  ;;  %v356_v17 = vld [vmem:[%s3572_s1] ss:$8 sm:$0x3]  ;;  %938 = vmatprep.mubr.f32.mxu0 %v2719_v18 }
  0x2d   : > { %v2850_v8 = vsub.s32 0, %v359_v3  ;;  %v2852_v9 = vsub.s32 1, %v359_v3  ;;  %352 = vst [vmem:[#allocation2] sm:$0x3] %v2719_v18  ;;  %353 = vst [vmem:[#allocation2 + $0x6] sm:$0x3] %v2719_v18 }
  0x2e   : > { %v2857_v11 = vsub.s32 %v369_v5, %v359_v3  ;;  %v2225_v23 = vld [vmem:[%s3572_s1 + $0x7] ss:$8 sm:$0x3]  ;;  %p331_p9 = scmp.lt.s32.totalorder %s2212_s22, 3  ;;  %s3594_s13 = smov 112   ;;  %vm434_vm0 = vcmask 916480  }
  0x2f   : > { %v418_v13 = vrot.slane %v2219_v4, %v2850_v8  ;;  %v422_v14 = vrot.slane %v2219_v4, %v2852_v9  ;;  %v605_v15 = vrot.slane %v2223_v6, %v2850_v8  ;;  %v609_v16 = vrot.slane %v2223_v6, %v2852_v9  ;;  %v2226_v30 = vld [vmem:[%s3572_s1 + $0x10] ss:$8 sm:$0x3]  ;;  %s3586_s17 = smov 1   ;;  %s3590_s25 = smov 113  }
  0x30   : > { %v475_v19 = vrot.slane %v2220_v7, %v2850_v8  ;;  %v479_v20 = vrot.slane %v2220_v7, %v2852_v9  ;;  %v660_v21 = vrot.slane %v2224_v10, %v2850_v8  ;;  %v664_v22 = vrot.slane %v2224_v10, %v2852_v9  ;;  %s3614_s22 = smov (!%p331_p9, %s2212_s22), 3  ;;  %s3584_s26 = smov 15  }
  0x31   : > { %v423_v24 = vcombine.low %v418_v13, %v422_v14  ;;  %v610_v25 = vcombine.low %v605_v15, %v609_v16  ;;  %v533_v26 = vrot.slane %v2221_v12, %v2850_v8  ;;  %v537_v27 = vrot.slane %v2221_v12, %v2852_v9  ;;  %s2213_s12 = sshll.u32 %s3614_s22, 1  ;;  %s3588_s10 = smov 127  }
  0x32   : > { %v480_v28 = vcombine.low %v475_v19, %v479_v20  ;;  %v665_v29 = vcombine.low %v660_v21, %v664_v22  ;;  %v361_v33 = vrot.slane %v356_v17, %v2850_v8  ;;  %v716_v34 = vrot.slane %v2225_v23, %v2850_v8  ;;  %s2902_s20 = scalar_lea.vmem %s3573_s2, %s2213_s12  ;;  %s2907_s22 = scalar_lea.vmem %s3574_s3, %s2213_s12 }
  0x33   : > { %v430_v31 = vrot.slane %v423_v24, %v2857_v11  ;;  %v617_v32 = vrot.slane %v610_v25, %v2857_v11  ;;  %v538_v36 = vcombine.low %v533_v26, %v537_v27  ;;  %v365_v37 = vrot.slane %v356_v17, %v2852_v9  ;;  %v347_v44 = vld [vmem:[%s2902_s20] sm:$0xf]  ;;  %s3592_s12 = smov 111   ;;  %s3580_s18 = smov 17  }
  0x34   : > { %v487_v35 = vrot.slane %v480_v28, %v2857_v11  ;;  %v720_v38 = vrot.slane %v2225_v23, %v2852_v9  ;;  %v672_v39 = vrot.slane %v665_v29, %v2857_v11  ;;  %v772_v40 = vrot.slane %v2226_v30, %v2850_v8  ;;  %v348_v45 = vld [vmem:[%s2907_s22] sm:$0xf]  ;;  %s3604_s24 = smov 15   ;;  %s3607_s0 = smov 112  }
  0x35   : > { %431 = vrot.lane.b32.xlu0 %v430_v31, %s3594_s13  ;;  %618 = vrot.lane.b32.xlu1 %v617_v32, %s3586_s17  ;;  %v776_v41 = vrot.slane %v2226_v30, %v2852_v9  ;;  %v349_v42 = vstv %s2870_s23  ;;  %v545_v47 = vrot.slane %v538_v36, %v2857_v11  ;;  %v366_v48 = vcombine.low %v361_v33, %v365_v37  ;;  %s3582_s23 = smov 16   ;;  %s327_s21 = sand.u32 1, %s2707_s28  }
  0x36   : > { %v721_v43 = vcombine.low %v716_v34, %v720_v38  ;;  %v350_v46 = vmul.f32 %v349_v42, %v348_v45  ;;  %vm577_vm1 = vcmask 7168   ;;  %vm491_vm2 = vcmask 924672  }
  0x37   : > { %v777_v50 = vcombine.low %v772_v40, %v776_v41  ;;  %v373_v52 = vrot.slane %v366_v48, %v2857_v11  ;;  %vm519_vm3 = vcmask 121856   ;;  %vm549_vm4 = vcmask 1039360  }
  0x38   : > { %v728_v49 = vrot.slane %v721_v43, %v2857_v11  ;;  %v351_v51 = vsub.f32 %v347_v44, %v350_v46  ;;  %vm377_vm5 = vcmask 908288   ;;  %vm461_vm6 = vcmask 130048  }
  0x39   : > { %488 = vrot.lane.b32.xlu0 %v487_v35, %s3590_s25  ;;  %673 = vrot.lane.b32.xlu1 %v672_v39, %s3584_s26  ;;  %v784_v53 = vrot.slane %v777_v50, %v2857_v11  ;;  %vm404_vm7 = vcmask 138240   ;;  %vm867_vm8 = vcmask 1041408   ;;  %vm854_vm9 = vcmask 146432  }
  0x3a   : > { %354 = vst [vmem:[#allocation2 + $0x2] sm:$0xf] %v351_v51  ;;  %vm1917_vm10 = vcmask 261120  }
  0x3d   : > { %546 = vrot.lane.b32.xlu0 %v545_v47, %s3588_s10  ;;  %729 = vrot.lane.b32.xlu1 %v728_v49, %s3582_s23 }
  0x41   : > { %374 = vrot.lane.b32.xlu0 %v373_v52, %s3592_s12  ;;  %785 = vrot.lane.b32.xlu1 %v784_v53, %s3580_s18  ;;  %v411_v56 = vld [vmem:[#allocation2] sm:$0x3f] }
  0x42   : > { %v598_v60 = vld [vmem:[#allocation2 + $0x2] sm:$0x3f] }
  0x43   : > { %v468_v1 = vld [vmem:[#allocation2] sm:$0x3f] }
  0x44   : > { %v653_v7 = vld [vmem:[#allocation2 + $0x2] sm:$0x3f] }
  0x45   : > { %v526_v21 = vld [vmem:[#allocation2] sm:$0x3f] }
  0x46   : > { %v355_v23 = vld [vmem:[#allocation2] sm:$0x3f] }
  0x47   : > { %v709_v30 = vld [vmem:[#allocation2 + $0x2] sm:$0x3f] }
  0x48   : > { %v2222_v51 = vld.sshfl [vmem:[#allocation2 + $0x2] sm:$0x33 pattern:$0x76325410] }
  0x49   : > { %v593_v52 = vcombine.high %v2222_v51, %v2222_v51  ;;  %596 = vst [vmem:[#allocation4 + $0x10] sm:$0x3] %v2222_v51 }
  0x4b   : > { %597 = vst [vmem:[#allocation4 + $0x18] sm:$0x3] %v593_v52 }
  0xa7   : > { %v432_v54 = vpop.permute.xlu0 %431  ;;  %v619_v55 = vpop.permute.xlu1 %618 }
  0xa8   : > { %v433_v57 = vrot.slane %v432_v54, 6  ;;  %v620_v58 = vrot.slane %v619_v55, 6 }
  0xaa   : > { %v435_v59 = vsel %vm434_vm0, %v433_v57, %v432_v54  ;;  %v621_v61 = vsel %vm577_vm1, %v620_v58, %v619_v55 }
  0xab   : > { %v437_v62 = vmul.f32 %v435_v59, %v411_v56  ;;  %v489_v63 = vpop.permute.xlu0 %488  ;;  %v674_v0 = vpop.permute.xlu1 %673  ;;  %v2924_v4 = vmul.f32 %v621_v61, %v598_v60  ;;  %v765_v60 = vld [vmem:[#allocation2 + $0x2] sm:$0x3f] }
  0xac   : > { %v490_v2 = vrot.slane %v489_v63, 6  ;;  %v675_v3 = vrot.slane %v674_v0, 6 }
  0xad   : > { %v453_v5 = vrot.slane %v437_v62, %v2857_v11  ;;  %v639_v17 = vrot.slane %v2924_v4, %v2857_v11  ;;  %v439_v44 = vcombine.low %v437_v62, %v437_v62  ;;  %v625_v49 = vcombine.low %v2924_v4, %v2924_v4 }
  0xae   : > { %v492_v6 = vsel %vm491_vm2, %v490_v2, %v489_v63  ;;  %v676_v10 = vsel %vm519_vm3, %v675_v3, %v674_v0 }
  0xaf   : > { %v494_v12 = vmul.f32 %v492_v6, %v468_v1  ;;  %v547_v13 = vpop.permute.xlu0 %546  ;;  %459 = vrot.lane.b32.xlu1 %v453_v5, %s3582_s23  ;;  %v2930_v15 = vmul.f32 %v676_v10, %v653_v7  ;;  %v730_v19 = vpop.permute.xlu1 %729  ;;  %v446_v47 = vrot.slane %v439_v44, %v2857_v11  ;;  %v632_v57 = vrot.slane %v625_v49, %v2857_v11  ;;  %v830_v10 = vld [vmem:[%s3576_s5] sm:$0xff] }
  0xb0   : > { %v548_v14 = vrot.slane %v547_v13, 6  ;;  %v731_v25 = vrot.slane %v730_v19, 6 }
  0xb1   : > { %v503_v16 = vrot.slane %v494_v12, %v2857_v11  ;;  %v687_v26 = vrot.slane %v2930_v15, %v2857_v11  ;;  %v496_v46 = vcombine.high %v494_v12, %v494_v12  ;;  %v680_v55 = vcombine.high %v2930_v15, %v2930_v15  ;;  %v831_v12 = vld [vmem:[%s3576_s5 + $0x8] sm:$0xff]  ;;  %v832_v15 = vld [vmem:[%s3576_s5 + $0x10] sm:$0xff] }
  0xb2   : > { %v550_v22 = vsel %vm549_vm4, %v548_v14, %v547_v13  ;;  %v732_v31 = vsel %vm461_vm6, %v731_v25, %v730_v19  ;;  %v454_v62 = vcombine.high %v446_v47, %v446_v47  ;;  %v640_v1 = vcombine.high %v632_v57, %v632_v57  ;;  %v833_v14 = vld [vmem:[%s3576_s5 + $0x18] sm:$0xff] }
  0xb3   : > { %v375_v20 = vpop.permute.xlu0 %374  ;;  %515 = vrot.lane.b32.xlu0 %v503_v16, %s3584_s26  ;;  %645 = vrot.lane.b32.xlu1 %v639_v17, %s3588_s10  ;;  %v552_v28 = vmul.f32 %v550_v22, %v526_v21  ;;  %v734_v34 = vmul.f32 %v732_v31, %v709_v30  ;;  %v511_v48 = vcombine.low %v503_v16, %v503_v16  ;;  %v786_v50 = vpop.permute.xlu1 %785  ;;  %v2728_v13 = vmov 0   ;;  %v999_v16 = vld [vmem:[%s3572_s1] ss:$8 sm:$0x3] }
  0xb4   : > { %v376_v24 = vrot.slane %v375_v20, 6  ;;  %v695_v53 = vcombine.low %v687_v26, %v687_v26  ;;  %v510_v54 = vrot.slane %v496_v46, %v2857_v11  ;;  %v787_v56 = vrot.slane %v786_v50, 6  ;;  %2390 = vset.pattern.permute.xlu1 %v2728_v13  ;;  %2389 = vset.pattern.permute.xlu0 %v2728_v13 }
  0xb5   : > { %v568_v36 = vrot.slane %v552_v28, %v2857_v11  ;;  %v554_v37 = vcombine.low %v552_v28, %v552_v28  ;;  %v750_v40 = vrot.slane %v734_v34, %v2857_v11  ;;  %v736_v41 = vcombine.low %v734_v34, %v734_v34 }
  0xb6   : > { %v378_v27 = vsel %vm377_vm5, %v376_v24, %v375_v20  ;;  %v512_v58 = vcombine.low %v510_v54, %v510_v54  ;;  %v694_v59 = vrot.slane %v680_v55, %v2857_v11  ;;  %v788_v61 = vsel %vm404_vm7, %v787_v56, %v786_v50  ;;  %v2233_v20 = vld [vmem:[%s3572_s1 + $0x1] ss:$8 sm:$0x3] }
  0xb7   : > { %v380_v29 = vmul.f32 %v378_v27, %v355_v23  ;;  %699 = vrot.lane.b32.xlu0 %v687_v26, %s3590_s25  ;;  %v570_v39 = vcombine.low %v568_v36, %v568_v36  ;;  %v561_v42 = vrot.slane %v554_v37, %v2857_v11  ;;  %v752_v43 = vcombine.low %v750_v40, %v750_v40  ;;  %v2234_v23 = vld [vmem:[%s3572_s1 + $0x2] ss:$8 sm:$0x3]  ;;  %v2235_v26 = vld [vmem:[%s3572_s1 + $0x3] ss:$8 sm:$0x3] }
  0xb8   : > { %v743_v45 = vrot.slane %v736_v41, %v2857_v11  ;;  %v790_v63 = vmul.f32 %v788_v61, %v765_v60  ;;  %v696_v0 = vcombine.low %v694_v59, %v694_v59  ;;  %v1008_v17 = vrot.slane %v999_v16, %v2852_v9 }
  0xb9   : > { %v382_v32 = vcombine.high %v380_v29, %v380_v29  ;;  %v389_v33 = vrot.slane %v380_v29, %v2857_v11  ;;  %v569_v3 = vcombine.low %v561_v42, %v561_v42  ;;  %v1004_v19 = vrot.slane %v999_v16, %v2850_v8  ;;  %v2236_v29 = vld [vmem:[%s3572_s1 + $0x5] ss:$8 sm:$0x3] }
  0xba   : > { %v799_v2 = vrot.slane %v790_v63, %v2857_v11  ;;  %v792_v4 = vcombine.high %v790_v63, %v790_v63  ;;  %v751_v5 = vcombine.low %v743_v45, %v743_v45  ;;  %v1110_v21 = vrot.slane %v2233_v20, %v2852_v9 }
  0xbb   : > { %398 = vrot.lane.b32.xlu0 %v389_v33, %s3580_s18  ;;  %v396_v35 = vrot.slane %v382_v32, %v2857_v11  ;;  %v397_v38 = vcombine.high %v389_v33, %v389_v33  ;;  %v1106_v22 = vrot.slane %v2233_v20, %v2850_v8  ;;  %v1212_v24 = vrot.slane %v2234_v23, %v2852_v9  ;;  %v2237_v32 = vld [vmem:[%s3572_s1 + $0x6] ss:$8 sm:$0x3] }
  0xbc   : > { %v807_v6 = vcombine.high %v799_v2, %v799_v2  ;;  %v806_v7 = vrot.slane %v792_v4, %v2857_v11  ;;  %v1208_v25 = vrot.slane %v2234_v23, %v2850_v8  ;;  %v1314_v27 = vrot.slane %v2235_v26, %v2852_v9 }
  0xbd   : > { %402 = vrot.lane.b32.xlu1 %v396_v35, %s3580_s18  ;;  %v1310_v28 = vrot.slane %v2235_v26, %v2850_v8  ;;  %v1432_v30 = vrot.slane %v2236_v29, %v2852_v9  ;;  %v1428_v31 = vrot.slane %v2236_v29, %v2850_v8  ;;  %v1534_v33 = vrot.slane %v2237_v32, %v2852_v9  ;;  %v2238_v35 = vld [vmem:[%s3572_s1 + $0x7] ss:$8 sm:$0x3]  ;;  %v822_v29 = vld [vmem:[%s3575_s4 + $0x10] sm:$0xff] }
  0xbe   : > { %v1530_v34 = vrot.slane %v2237_v32, %v2850_v8  ;;  %v1636_v36 = vrot.slane %v2238_v35, %v2852_v9  ;;  %v1632_v37 = vrot.slane %v2238_v35, %v2850_v8  ;;  %v820_v26 = vld [vmem:[%s3575_s4] sm:$0xff] }
  0xbf   : > { %400 = vrot.lane.b32.xlu0 %v397_v38, %s3580_s18  ;;  %s3602_s18 = smov 127   ;;  %v2239_v38 = vld [vmem:[%s3572_s1 + $0x10] ss:$8 sm:$0x3] }
  0xc0   : > { %v1734_v40 = vrot.slane %v2239_v38, %v2850_v8 }
  0xc1   : > { %575 = vrot.lane.b32.xlu1 %v570_v39, %s3586_s17  ;;  %v1738_v39 = vrot.slane %v2239_v38, %v2852_v9 }
  0xc3   : > { %573 = vrot.lane.b32.xlu0 %v561_v42, %s3586_s17 }
  0xc5   : > { %757 = vrot.lane.b32.xlu1 %v752_v43, %s3594_s13 }
  0xc7   : > { %755 = vrot.lane.b32.xlu0 %v743_v45, %s3594_s13 }
  0xc9   : > { %455 = vrot.lane.b32.xlu1 %v446_v47, %s3582_s23 }
  0xcb   : > { %513 = vrot.lane.b32.xlu0 %v511_v48, %s3584_s26 }
  0xcd   : > { %697 = vrot.lane.b32.xlu1 %v695_v53, %s3590_s25 }
  0xcf   : > { %641 = vrot.lane.b32.xlu0 %v632_v57, %s3588_s10 }
  0xd1   : > { %517 = vrot.lane.b32.xlu1 %v512_v58, %s3584_s26  ;;  %s3606_s26 = smov 17  }
  0xd3   : > { %457 = vrot.lane.b32.xlu0 %v454_v62, %s3582_s23  ;;  %s3601_s23 = smov 113  }
  0xd5   : > { %701 = vrot.lane.b32.xlu1 %v696_v0, %s3590_s25  ;;  %s3603_s25 = smov 1  }
  0xd7   : > { %643 = vrot.lane.b32.xlu0 %v640_v1, %s3588_s10  ;;  %s2211_s10 = sshll.u32 %s327_s21, 2 }
  0xd9   : > { %571 = vrot.lane.b32.xlu1 %v569_v3, %s3586_s17  ;;  %s3605_s17 = smov 16  }
  0xdb   : > { %753 = vrot.lane.b32.xlu0 %v751_v5, %s3594_s13 }
  0xdd   : > { %810 = vrot.lane.b32.xlu1 %v807_v6, %s3592_s12 }
  0xdf   : > { %812 = vrot.lane.b32.xlu0 %v806_v7, %s3592_s12 }
  0xe1   : > { %808 = vrot.lane.b32.xlu1 %v799_v2, %s3592_s12 }
  0xe3   : > { %836 = vperm.xlu0 %2389, %v830_v10  }
  0xe5   : > { %841 = vperm.xlu1 %2390, %v831_v12  }
  0xe7   : > { %851 = vperm.xlu0 %2389, %v833_v14  }
  0xe9   : > { %846 = vperm.xlu1 %2390, %v832_v15  }
  0xeb   : > { %1011 = vrot.lane.b32.xlu0 %v1008_v17, %s3592_s12 }
  0xed   : > { %1009 = vrot.lane.b32.xlu1 %v1004_v19, %s3592_s12 }
  0xef   : > { %1113 = vrot.lane.b32.xlu0 %v1110_v21, %s3594_s13 }
  0xf1   : > { %1111 = vrot.lane.b32.xlu1 %v1106_v22, %s3594_s13  ;;  %s3608_s13 = smov 111  }
  0xf3   : > { %1215 = vrot.lane.b32.xlu0 %v1212_v24, %s3601_s23 }
  0xf5   : > { %1213 = vrot.lane.b32.xlu1 %v1208_v25, %s3601_s23 }
  0xf7   : > { %1317 = vrot.lane.b32.xlu0 %v1314_v27, %s3602_s18 }
  0xf9   : > { %1315 = vrot.lane.b32.xlu1 %v1310_v28, %s3602_s18  ;;  %v821_v28 = vld [vmem:[%s3575_s4 + $0x8] sm:$0xff] }
  0xfb   : > { %1435 = vrot.lane.b32.xlu0 %v1432_v30, %s3603_s25  ;;  %v823_v30 = vld [vmem:[%s3575_s4 + $0x18] sm:$0xff] }
  0xfd   : > { %1433 = vrot.lane.b32.xlu1 %v1428_v31, %s3603_s25 }
  0xff   : > { %1537 = vrot.lane.b32.xlu0 %v1534_v33, %s3604_s24 }
 0x101   : > { %1535 = vrot.lane.b32.xlu1 %v1530_v34, %s3604_s24 }
 0x103   : > { %1639 = vrot.lane.b32.xlu0 %v1636_v36, %s3605_s17 }
 0x105   : > { %1637 = vrot.lane.b32.xlu1 %v1632_v37, %s3605_s17 }
 0x107   : > { %1741 = vrot.lane.b32.xlu0 %v1738_v39, %s3606_s26 }
 0x109   : > { %1739 = vrot.lane.b32.xlu1 %v1734_v40, %s3606_s26 }
 0x121   : > { %v460_v41 = vpop.permute.xlu1 %459 }
 0x125   : > { %v516_v42 = vpop.permute.xlu0 %515  ;;  %v646_v44 = vpop.permute.xlu1 %645 }
 0x129   : > { %v700_v43 = vpop.permute.xlu0 %699 }
 0x12d   : > { %v399_v45 = vpop.permute.xlu0 %398 }
 0x12f   : > { %v403_v46 = vpop.permute.xlu1 %402 }
 0x131   : > { %v401_v47 = vpop.permute.xlu0 %400 }
 0x132   : > { %v405_v48 = vsel %vm404_vm7, %v399_v45, %v401_v47  ;;  %v406_v49 = vsel %vm404_vm7, %v401_v47, %v403_v46 }
 0x133   : > { %409 = vst [vmem:[#allocation4] sm:$0x3] %v405_v48  ;;  %410 = vst [vmem:[#allocation4 + $0x8] sm:$0x3] %v406_v49  ;;  %v576_v9 = vpop.permute.xlu1 %575 }
 0x135   : > { %v574_v50 = vpop.permute.xlu0 %573 }
 0x136   : > { %v579_v8 = vsel %vm577_vm1, %v574_v50, %v576_v9 }
 0x137   : > { %583 = vst [vmem:[#allocation4 + $0x8] sm:$0xc0] %v579_v8  ;;  %v758_v51 = vpop.permute.xlu1 %757 }
 0x139   : > { %v756_v52 = vpop.permute.xlu0 %755 }
 0x13a   : > { %v760_v53 = vsel %vm434_vm0, %v756_v52, %v758_v51 }
 0x13b   : > { %764 = vst [vmem:[#allocation4 + $0x18] sm:$0xc0] %v760_v53  ;;  %v456_v54 = vpop.permute.xlu1 %455 }
 0x13d   : > { %v514_v55 = vpop.permute.xlu0 %513 }
 0x13e   : > { %v520_v56 = vsel %vm519_vm3, %v514_v55, %v516_v42 }
 0x13f   : > { %524 = vst [vmem:[#allocation4] sm:$0x30] %v520_v56  ;;  %v698_v57 = vpop.permute.xlu1 %697 }
 0x140   : > { %v703_v58 = vsel %vm491_vm2, %v698_v57, %v700_v43 }
 0x141   : > { %707 = vst [vmem:[#allocation4 + $0x10] sm:$0x30] %v703_v58  ;;  %v642_v59 = vpop.permute.xlu0 %641 }
 0x143   : > { %v518_v60 = vpop.permute.xlu1 %517 }
 0x144   : > { %v521_v61 = vsel %vm519_vm3, %v516_v42, %v518_v60 }
 0x145   : > { %525 = vst [vmem:[#allocation4 + $0x8] sm:$0x30] %v521_v61  ;;  %v458_v62 = vpop.permute.xlu0 %457 }
 0x146   : > { %v462_v63 = vsel %vm461_vm6, %v456_v54, %v458_v62  ;;  %v463_v0 = vsel %vm461_vm6, %v458_v62, %v460_v41 }
 0x147   : > { %466 = vst [vmem:[#allocation4] sm:$0xc] %v462_v63  ;;  %467 = vst [vmem:[#allocation4 + $0x8] sm:$0xc] %v463_v0  ;;  %v702_v1 = vpop.permute.xlu1 %701 }
 0x148   : > { %v704_v2 = vsel %vm491_vm2, %v700_v43, %v702_v1 }
 0x149   : > { %708 = vst [vmem:[#allocation4 + $0x18] sm:$0x30] %v704_v2  ;;  %v644_v3 = vpop.permute.xlu0 %643 }
 0x14a   : > { %v647_v4 = vsel %vm549_vm4, %v642_v59, %v644_v3  ;;  %v648_v5 = vsel %vm549_vm4, %v644_v3, %v646_v44 }
 0x14b   : > { %651 = vst [vmem:[#allocation4 + $0x10] sm:$0xc] %v647_v4  ;;  %652 = vst [vmem:[#allocation4 + $0x18] sm:$0xc] %v648_v5  ;;  %v572_v6 = vpop.permute.xlu1 %571 }
 0x14c   : > { %v578_v7 = vsel %vm577_vm1, %v572_v6, %v574_v50 }
 0x14d   : > { %582 = vst [vmem:[#allocation4] sm:$0xc0] %v578_v7  ;;  %v754_v10 = vpop.permute.xlu0 %753 }
 0x14e   : > { %v759_v12 = vsel %vm434_vm0, %v754_v10, %v756_v52  ;;  %v825_v16 = vld [vmem:[#allocation4 + $0x8] sm:$0xff] }
 0x14f   : > { %763 = vst [vmem:[#allocation4 + $0x10] sm:$0xc0] %v759_v12  ;;  %v811_v13 = vpop.permute.xlu1 %810 }
 0x151   : > { %v813_v14 = vpop.permute.xlu0 %812 }
 0x152   : > { %v815_v15 = vsel %vm377_vm5, %v811_v13, %v813_v14  ;;  %v827_v17 = vld [vmem:[#allocation4 + $0x18] sm:$0xff] }
 0x153   : > { %819 = vst [vmem:[#allocation4 + $0x28] sm:$0x3] %v815_v15  ;;  %v809_v19 = vpop.permute.xlu1 %808  ;;  %v2248_v20 = vpack.c.bf16 %v827_v17, %v825_v16 }
 0x154   : > { %v814_v21 = vsel %vm377_vm5, %v809_v19, %v811_v13  ;;  %v824_v22 = vld [vmem:[#allocation4] sm:$0xff] }
 0x155   : > { %818 = vst [vmem:[#allocation4 + $0x20] sm:$0x3] %v814_v21  ;;  %2249 = vmatprep.subr.bf16.mxu0 %v2248_v20 }
 0x156   : > { %v826_v23 = vld [vmem:[#allocation4 + $0x10] sm:$0xff] }
 0x157   : > { %v2250_v24 = vpack.c.bf16 %v826_v23, %v824_v22 }
 0x159   : > { %2251 = vmatpush1.bf16.msra.mxu0 %v2250_v24 }
 0x15a   : > { %v829_v25 = vld [vmem:[#allocation4 + $0x28] sm:$0x3] }
 0x15b   : > { %2227 = vmatprep.subr.msk.mxu0 %vm867_vm8, %v829_v25 }
 0x15c   : > { %v828_v27 = vld [vmem:[#allocation4 + $0x20] sm:$0x3] }
 0x15d   : > { %2228 = vmatpush1.msk.msra.mxu0 %vm867_vm8, %v828_v27 }
 0x15e   : > { %2229 = vmatmul.mubr.msk.f32.vlgmr.msra.gmra.mrb[0].mxu0 %vm854_vm9, %v820_v26 }
 0x15f   : > { %944 = vmatprep.mubr.f32.mxu0 %v2719_v18 }
 0x162   : > { %2230 = vmatmul.mubr.msk.f32.gmra.mrb[2].mxu0 %vm854_vm9, %v821_v28  ;;  %v837_v44 = vpop.permute.xlu0 %836 }
 0x163   : > { %950 = vmatprep.mubr.f32.mxu0 %v2719_v18 }
 0x164   : > { %v842_v31 = vpop.permute.xlu1 %841 }
 0x166   : > { %2231 = vmatmul.mubr.msk.f32.gmra.mrb[4].mxu0 %vm854_vm9, %v822_v29  ;;  %v852_v45 = vpop.permute.xlu0 %851 }
 0x167   : > { %956 = vmatprep.mubr.f32.mxu0 %v2719_v18 }
 0x168   : > { %v847_v32 = vpop.permute.xlu1 %846 }
 0x16a   : > { %2232 = vmatmul.mubr.msk.f32.gmra.mrb[6].mxu0 %vm854_vm9, %v823_v30  ;;  %v3088_v46 = vpop.permute.xlu0 %1011 }
 0x16b   : > { %2055 = vmatprep.mubr.f32.mxu0 %v2719_v18 }
 0x16c   : > { %v1010_v33 = vpop.permute.xlu1 %1009 }
 0x16d   : > { %v1017_v34 = vmul.f32 0.0, %v1010_v33  ;;  %v3096_v51 = vsel %vm377_vm5, %v1010_v33, %v3088_v46 }
 0x16e   : > { %v3090_v47 = vpop.permute.xlu0 %1113 }
 0x16f   : > { %v2396_v35 = vpack.i.bf16 %v1017_v34, %v1017_v34 }
 0x170   : > { %v1112_v36 = vpop.permute.xlu1 %1111 }
 0x171   : > { %v1119_v37 = vmul.f32 0.0, %v1112_v36  ;;  %2392 = vrot.lane.b32.xlu1 %v2396_v35, %s3606_s26  ;;  %2397 = vrot.lane.b32.xlu0 %v2396_v35, %s3606_s26  ;;  %v1115_v54 = vsel %vm434_vm0, %v1112_v36, %v3090_v47 }
 0x172   : > { %v3092_v48 = vpop.permute.xlu0 %1215 }
 0x173   : > { %v2406_v38 = vpack.i.bf16 %v1119_v37, %v1119_v37 }
 0x174   : > { %v1214_v39 = vpop.permute.xlu1 %1213 }
 0x175   : > { %v1221_v40 = vmul.f32 0.0, %v1214_v39  ;;  %2402 = vrot.lane.b32.xlu1 %v2406_v38, %s3605_s17  ;;  %2407 = vrot.lane.b32.xlu0 %v2406_v38, %s3605_s17  ;;  %v3106_v55 = vsel %vm491_vm2, %v1214_v39, %v3092_v48 }
 0x176   : > { %v3098_v52 = vpop.permute.xlu0 %1317 }
 0x177   : > { %v2416_v41 = vpack.i.bf16 %v1221_v40, %v1221_v40 }
 0x178   : > { %v1316_v42 = vpop.permute.xlu1 %1315 }
 0x179   : > { %v1323_v18 = vmul.f32 0.0, %v1316_v42  ;;  %2412 = vrot.lane.b32.xlu1 %v2416_v41, %s3604_s24  ;;  %2417 = vrot.lane.b32.xlu0 %v2416_v41, %s3604_s24  ;;  %v3110_v56 = vsel %vm549_vm4, %v1316_v42, %v3098_v52 }
 0x17b   : > { %v2426_v43 = vpack.i.bf16 %v1323_v18, %v1323_v18 }
 0x17c   : > { %v1434_v21 = vpop.permute.xlu1 %1433 }
 0x17d   : > { %2422 = vrot.lane.b32.xlu1 %v2426_v43, %s3603_s25  ;;  %2427 = vrot.lane.b32.xlu0 %v2426_v43, %s3603_s25 }
 0x231   : > { %v940_v49 = vpop.f32.mrb[0].mxu0 }
 0x232   : > { %v941_v9 = vadd.f32 %v940_v49, %v837_v44  ;;  %v942_v50 = vpop.f32.mrb[1].mxu0 }
 0x233   : > { %v943_v8 = vadd.f32 %v942_v50, %v837_v44 }
 0x234   : > { %v3100_v53 = vmax.f32 %v941_v9, 0.0 }
 0x235   : > { %v3112_v57 = vmax.f32 %v943_v8, 0.0  ;;  %v946_v58 = vpop.f32.mrb[2].mxu0 }
 0x236   : > { %v947_v59 = vadd.f32 %v946_v58, %v842_v31  ;;  %v948_v60 = vpop.f32.mrb[3].mxu0  ;;  %v1018_v61 = vmul.f32 %v3096_v51, %v3100_v53  ;;  %v1120_v62 = vmul.f32 %v1115_v54, %v3100_v53  ;;  %v1222_v63 = vmul.f32 %v3106_v55, %v3100_v53 }
 0x237   : > { %v949_v0 = vadd.f32 %v948_v60, %v842_v31  ;;  %v1019_v1 = vmul.f32 %v3088_v46, %v3112_v57  ;;  %v1121_v2 = vmul.f32 %v3090_v47, %v3112_v57  ;;  %v1223_v3 = vmul.f32 %v3092_v48, %v3112_v57 }
 0x238   : > { %v3125_v4 = vmax.f32 %v947_v59, 0.0  ;;  %v3129_v5 = vmul.f32 %v3110_v56, %v3100_v53  ;;  %v3133_v6 = vmul.f32 %v3098_v52, %v3112_v57  ;;  %v3183_v50 = vmul.f32 %v1434_v21, %v3100_v53 }
 0x239   : > { %v3135_v7 = vmax.f32 %v949_v0, 0.0  ;;  %v952_v10 = vpop.f32.mrb[4].mxu0  ;;  %v2431_v12 = vpack.i.bf16 %v1019_v1, %v1018_v61  ;;  %v2436_v13 = vpack.i.bf16 %v1121_v2, %v1120_v62  ;;  %v2441_v14 = vpack.i.bf16 %v1223_v3, %v1222_v63  ;;  %v1436_v3 = vpop.permute.xlu0 %1435 }
 0x23a   : > { %v953_v15 = vadd.f32 %v952_v10, %v847_v32  ;;  %v954_v16 = vpop.f32.mrb[5].mxu0  ;;  %v1021_v17 = vmul.f32 %v3096_v51, %v3125_v4  ;;  %v1123_v19 = vmul.f32 %v1115_v54, %v3125_v4  ;;  %v1225_v20 = vmul.f32 %v3106_v55, %v3125_v4 }
 0x23b   : > { %v955_v22 = vadd.f32 %v954_v16, %v847_v32  ;;  %2432 = vrot.lane.b32.xlu1 %v2431_v12, %s3606_s26  ;;  %v1022_v23 = vmul.f32 %v3088_v46, %v3135_v7  ;;  %v1124_v24 = vmul.f32 %v3090_v47, %v3135_v7  ;;  %v1226_v25 = vmul.f32 %v3092_v48, %v3135_v7 }
 0x23c   : > { %v3149_v26 = vmax.f32 %v953_v15, 0.0  ;;  %v2446_v27 = vpack.i.bf16 %v3133_v6, %v3129_v5  ;;  %v1327_v28 = vmul.f32 %v3110_v56, %v3125_v4  ;;  %v1328_v29 = vmul.f32 %v3098_v52, %v3135_v7 }
 0x23d   : > { %v3157_v30 = vmax.f32 %v955_v22, 0.0  ;;  %v958_v31 = vpop.f32.mrb[6].mxu0  ;;  %v2451_v32 = vpack.i.bf16 %v1022_v23, %v1021_v17  ;;  %v2456_v33 = vpack.i.bf16 %v1124_v24, %v1123_v19  ;;  %v2461_v34 = vpack.i.bf16 %v1226_v25, %v1225_v20 }
 0x23e   : > { %v959_v35 = vadd.f32 %v958_v31, %v852_v45  ;;  %v960_v36 = vpop.f32.mrb[7].mxu0  ;;  %v2466_v37 = vpack.i.bf16 %v1328_v29, %v1327_v28  ;;  %v1024_v38 = vmul.f32 %v3096_v51, %v3149_v26  ;;  %v1126_v41 = vmul.f32 %v1115_v54, %v3149_v26 }
 0x23f   : > { %v961_v39 = vadd.f32 %v960_v36, %v852_v45  ;;  %2452 = vrot.lane.b32.xlu0 %v2451_v32, %s3606_s26  ;;  %2437 = vrot.lane.b32.xlu1 %v2436_v13, %s3605_s17  ;;  %v1025_v40 = vmul.f32 %v3088_v46, %v3157_v30  ;;  %v1127_v18 = vmul.f32 %v3090_v47, %v3157_v30  ;;  %v3178_v45 = vpop.permute.xlu1 %1535 }
 0x240   : > { %v3166_v42 = vmax.f32 %v959_v35, 0.0  ;;  %v3172_v43 = vmul.f32 %v3106_v55, %v3149_v26  ;;  %v3176_v44 = vmul.f32 %v3092_v48, %v3157_v30  ;;  %v3186_v8 = vmul.f32 %v1434_v21, %v3125_v4 }
 0x241   : > { %v3180_v49 = vmax.f32 %v961_v39, 0.0  ;;  %v2471_v9 = vpack.i.bf16 %v1025_v40, %v1024_v38  ;;  %v2476_v59 = vpack.i.bf16 %v1127_v18, %v1126_v41  ;;  %v1546_v19 = vmul.f32 %v3178_v45, %v3125_v4  ;;  %v1538_v18 = vpop.permute.xlu0 %1537 }
 0x242   : > { %v1027_v58 = vmul.f32 %v3096_v51, %v3166_v42  ;;  %v1129_v60 = vmul.f32 %v1115_v54, %v3166_v42  ;;  %v2481_v61 = vpack.i.bf16 %v3176_v44, %v3172_v43  ;;  %v2511_v0 = vpack.i.bf16 %v3186_v8, %v3183_v50 }
 0x243   : > { %2457 = vrot.lane.b32.xlu0 %v2456_v33, %s3605_s17  ;;  %2442 = vrot.lane.b32.xlu1 %v2441_v14, %s3604_s24  ;;  %v1028_v62 = vmul.f32 %v3088_v46, %v3180_v49  ;;  %v1130_v63 = vmul.f32 %v3090_v47, %v3180_v49  ;;  %v1330_v51 = vmul.f32 %v3110_v56, %v3149_v26  ;;  %v1638_v13 = vpop.permute.xlu1 %1637  ;;  %v1545_v50 = vmul.f32 0.0, %v1538_v18 }
 0x244   : > { %v1331_v54 = vmul.f32 %v3098_v52, %v3157_v30  ;;  %v1231_v1 = vmul.f32 %v3106_v55, %v3166_v42  ;;  %v1232_v2 = vmul.f32 %v3092_v48, %v3180_v49  ;;  %v3210_v47 = vsel %vm577_vm1, %v1434_v21, %v1436_v3 }
 0x245   : > { %v2491_v46 = vpack.i.bf16 %v1028_v62, %v1027_v58  ;;  %v2506_v5 = vpack.i.bf16 %v1130_v63, %v1129_v60  ;;  %v1333_v12 = vmul.f32 %v3110_v56, %v3166_v42  ;;  %v1334_v55 = vmul.f32 %v3098_v52, %v3180_v49 }
 0x246   : > { %v2486_v6 = vpack.i.bf16 %v1331_v54, %v1330_v51  ;;  %v2526_v10 = vpack.i.bf16 %v1232_v2, %v1231_v1  ;;  %v3218_v48 = vmul.f32 0.0, %v1436_v3  ;;  %v1447_v14 = vmul.f32 %v1434_v21, %v3149_v26 }
 0x247   : > { %2462 = vrot.lane.b32.xlu0 %v2461_v34, %s3604_s24  ;;  %2447 = vrot.lane.b32.xlu1 %v2446_v27, %s3603_s25  ;;  %v1450_v15 = vmul.f32 %v1434_v21, %v3166_v42  ;;  %v1442_v16 = vmul.f32 %v3210_v47, %v3112_v57  ;;  %v2541_v17 = vpack.i.bf16 %v1334_v55, %v1333_v12  ;;  %v1740_v27 = vpop.permute.xlu1 %1739 }
 0x248   : > { %v1543_v56 = vmul.f32 %v3178_v45, %v3100_v53  ;;  %v1645_v22 = vmul.f32 %v1638_v13, %v3100_v53  ;;  %v1648_v52 = vmul.f32 %v1638_v13, %v3125_v4  ;;  %v1549_v24 = vmul.f32 %v3178_v45, %v3149_v26 }
 0x249   : > { %v2521_v20 = vpack.i.bf16 %v1450_v15, %v1447_v14  ;;  %v1552_v25 = vmul.f32 %v3178_v45, %v3166_v42  ;;  %v2496_v28 = vpack.i.bf16 %v3218_v48, %v1442_v16  ;;  %v3240_v31 = vmul.f32 %v1740_v27, %v3100_v53 }
 0x24a   : > { %v2546_v21 = vpack.i.bf16 %v1546_v19, %v1543_v56  ;;  %v2571_v23 = vpack.i.bf16 %v1648_v52, %v1645_v22  ;;  %v3243_v32 = vmul.f32 %v1740_v27, %v3125_v4  ;;  %v3246_v33 = vmul.f32 %v1638_v13, %v3149_v26 }
 0x24b   : > { %2467 = vrot.lane.b32.xlu0 %v2466_v37, %s3603_s25  ;;  %2492 = vrot.lane.b32.xlu1 %v2491_v46, %s3606_s26  ;;  %v2556_v29 = vpack.i.bf16 %v1552_v25, %v1549_v24  ;;  %v3249_v34 = vmul.f32 %v1638_v13, %v3166_v42  ;;  %v3254_v36 = vmul.f32 %v1740_v27, %v3149_v26  ;;  %v3326_v24 = vld [vmem:[%s3577_s6] sm:$0x3f] }
 0x24c   : > { %v2591_v35 = vpack.i.bf16 %v3243_v32, %v3240_v31  ;;  %v3257_v37 = vmul.f32 %v1740_v27, %v3166_v42  ;;  %v2284_v40 = vpack.c.bf16 %v3135_v7, %v3112_v57  ;;  %v2286_v41 = vpack.c.bf16 %v3125_v4, %v3100_v53  ;;  %v1892_v31 = vld [vmem:[%s3578_s7] sm:$0x3]  ;;  %v2393_v32 = vpop.permute.xlu1 %2392 }
 0x24d   : > { %v2606_v38 = vpack.i.bf16 %v3249_v34, %v3246_v33  ;;  %v2288_v43 = vpack.c.bf16 %v3180_v49, %v3157_v30  ;;  %v2290_v44 = vpack.c.bf16 %v3166_v42, %v3149_v26  ;;  %v1445_v8 = vmul.f32 %v3210_v47, %v3135_v7 }
 0x24e   : > { %v2626_v39 = vpack.i.bf16 %v3257_v37, %v3254_v36  ;;  %v3330_v25 = vrot.slane %v3326_v24, %v2857_v11  ;;  %v2395_v37 = vunpack.i.h.bf16 %v2393_v32 }
 0x24f   : > { %2472 = vrot.lane.b32.xlu0 %v2471_v9, %s3606_s26  ;;  %2497 = vrot.lane.b32.xlu1 %v2496_v28, %s3602_s18  ;;  %v1539_v9 = vsel %vm519_vm3, %v3178_v45, %v1538_v18  ;;  %v1448_v45 = vmul.f32 %v3210_v47, %v3157_v30  ;;  %s2216_s26 = sld [smem:[#allocation6 + $0x1]] }
 0x250   : > { %v1544_v58 = vmul.f32 %v1539_v9, %v3112_v57  ;;  %v1547_v51 = vmul.f32 %v1539_v9, %v3135_v7  ;;  %v1550_v3 = vmul.f32 %v1539_v9, %v3157_v30  ;;  %v3348_v34 = vpop.permute.xlu1 %2402 }
 0x251   : > { %v2516_v62 = vpack.i.bf16 %v3218_v48, %v1448_v45 }
 0x252   : > { %v2531_v60 = vpack.i.bf16 %v1545_v50, %v1544_v58  ;;  %v2536_v1 = vpack.i.bf16 %v1545_v50, %v1547_v51 }
 0x253   : > { %2477 = vrot.lane.b32.xlu0 %v2476_v59, %s3605_s17  ;;  %2507 = vrot.lane.b32.xlu1 %v2506_v5, %s3605_s17  ;;  %v2501_v59 = vpack.i.bf16 %v3218_v48, %v1445_v8  ;;  %v2551_v5 = vpack.i.bf16 %v1545_v50, %v1550_v3  ;;  %s2218_s17 = sld [smem:[#allocation6 + $0x3]] }
 0x257   : > { %2482 = vrot.lane.b32.xlu0 %v2481_v61, %s3604_s24  ;;  %2512 = vrot.lane.b32.xlu1 %v2511_v0, %s3602_s18  ;;  %v1640_v61 = vpop.permute.xlu0 %1639 }
 0x258   : > { %v1641_v63 = vsel %vm461_vm6, %v1638_v13, %v1640_v61  ;;  %v1647_v0 = vmul.f32 0.0, %v1640_v61 }
 0x259   : > { %v1646_v54 = vmul.f32 %v1641_v63, %v3112_v57  ;;  %v1649_v13 = vmul.f32 %v1641_v63, %v3135_v7  ;;  %v1652_v19 = vmul.f32 %v1641_v63, %v3157_v30 }
 0x25b   : > { %2487 = vrot.lane.b32.xlu0 %v2486_v6, %s3603_s25  ;;  %2527 = vrot.lane.b32.xlu1 %v2526_v10, %s3604_s24  ;;  %v2561_v2 = vpack.i.bf16 %v1647_v0, %v1646_v54  ;;  %v1742_v46 = vpop.permute.xlu0 %1741  ;;  %v1451_v6 = vmul.f32 %v3210_v47, %v3180_v49  ;;  %v2566_v15 = vpack.i.bf16 %v1647_v0, %v1649_v13  ;;  %s2217_s24 = sld [smem:[#allocation6 + $0x2]] }
 0x25c   : > { %v1743_v10 = vsel %vm404_vm7, %v1740_v27, %v1742_v46  ;;  %v1749_v14 = vmul.f32 0.0, %v1742_v46  ;;  %v1553_v47 = vmul.f32 %v1539_v9, %v3180_v49  ;;  %v1914_v27 = vcombine.high %v3330_v25, %v3330_v25 }
 0x25d   : > { %v2581_v12 = vpack.i.bf16 %v3218_v48, %v1451_v6  ;;  %v1751_v55 = vmul.f32 %v1743_v10, %v3135_v7  ;;  %v1754_v22 = vmul.f32 %v1743_v10, %v3157_v30 }
 0x25e   : > { %v2596_v48 = vpack.i.bf16 %v1545_v50, %v1553_v47  ;;  %1984 = vmatprep.mubr.f32.mxu1 %v1914_v27 }
 0x25f   : > { %2502 = vrot.lane.b32.xlu0 %v2501_v59, %s3602_s18  ;;  %2532 = vrot.lane.b32.xlu1 %v2531_v60, %s3601_s23  ;;  %v2586_v16 = vpack.i.bf16 %v1749_v14, %v1751_v55  ;;  %v2611_v52 = vpack.i.bf16 %v1749_v14, %v1754_v22  ;;  %v2398_v33 = vpop.permute.xlu0 %2397  ;;  %v2405_v22 = vunpack.i.h.bf16 %v3348_v34 }
 0x263   : > { %2517 = vrot.lane.b32.xlu0 %v2516_v62, %s3602_s18  ;;  %2542 = vrot.lane.b32.xlu1 %v2541_v17, %s3603_s25  ;;  %v1748_v17 = vmul.f32 %v1743_v10, %v3112_v57 }
 0x265   : > { %v2576_v56 = vpack.i.bf16 %v1749_v14, %v1748_v17 }
 0x267   : > { %2522 = vrot.lane.b32.xlu0 %v2521_v20, %s3602_s18  ;;  %2547 = vrot.lane.b32.xlu1 %v2546_v21, %s3601_s23  ;;  %v2601_v20 = vpack.i.bf16 %v1647_v0, %v1652_v19  ;;  %v1757_v21 = vmul.f32 %v1743_v10, %v3180_v49 }
 0x269   : > { %v2621_v28 = vpack.i.bf16 %v1749_v14, %v1757_v21 }
 0x26b   : > { %2537 = vrot.lane.b32.xlu0 %v2536_v1, %s3601_s23  ;;  %2562 = vrot.lane.b32.xlu1 %v2561_v2, %s3607_s0 }
 0x26f   : > { %2552 = vrot.lane.b32.xlu0 %v2551_v5, %s3601_s23  ;;  %2572 = vrot.lane.b32.xlu1 %v2571_v23, %s3607_s0  ;;  %v1655_v23 = vmul.f32 %v1641_v63, %v3180_v49 }
 0x273   : > { %2557 = vrot.lane.b32.xlu0 %v2556_v29, %s3601_s23  ;;  %2582 = vrot.lane.b32.xlu1 %v2581_v12, %s3602_s18  ;;  %v2616_v29 = vpack.i.bf16 %v1647_v0, %v1655_v23  ;;  %s2108_s18 = scalar_lea.sflag [#allocation7], %s327_s21 }
 0x277   : > { %2567 = vrot.lane.b32.xlu0 %v2566_v15, %s3607_s0  ;;  %2587 = vrot.lane.b32.xlu1 %v2586_v16, %s3608_s13 }
 0x27b   : > { %2597 = vrot.lane.b32.xlu1 %v2596_v48, %s3601_s23  ;;  %2577 = vrot.lane.b32.xlu0 %v2576_v56, %s3608_s13  ;;  %v2400_v48 = vunpack.i.h.bf16 %v2398_v33  ;;  %v2399_v56 = vunpack.i.l.bf16 %v2398_v33 }
 0x27f   : > { %2602 = vrot.lane.b32.xlu1 %v2601_v20, %s3607_s0  ;;  %2592 = vrot.lane.b32.xlu0 %v2591_v35, %s3608_s13  ;;  %v3350_v35 = vpop.permute.xlu0 %2407 }
 0x283   : > { %2607 = vrot.lane.b32.xlu1 %v2606_v38, %s3607_s0  ;;  %2612 = vrot.lane.b32.xlu0 %v2611_v52, %s3608_s13  ;;  %v3352_v38 = vpop.permute.xlu1 %2412  ;;  %v3354_v18 = vpop.permute.xlu0 %2417 }
 0x287   : > { %2622 = vrot.lane.b32.xlu1 %v2621_v28, %s3608_s13  ;;  %2617 = vrot.lane.b32.xlu0 %v2616_v29, %s3607_s0  ;;  %v3356_v9 = vpop.permute.xlu1 %2422  ;;  %v3358_v50 = vpop.permute.xlu0 %2427  ;;  %v2404_v29 = vunpack.i.l.bf16 %v3348_v34 }
 0x28b   : > { %1895 = vperm.xlu1 %2390, %v1892_v31   ;;  %2627 = vrot.lane.b32.xlu0 %v2626_v39, %s3608_s13  ;;  %v2394_v39 = vunpack.i.l.bf16 %v2393_v32 }
 0x2ad   : > { %v2433_v8 = vpop.permute.xlu1 %2432 }
 0x2ae   : > { %v2435_v58 = vunpack.i.h.bf16 %v2433_v8  ;;  %v2434_v59 = vunpack.i.l.bf16 %v2433_v8 }
 0x2b0   : > { %v1066_v62 = vsel %vm404_vm7, %v2434_v59, %v2435_v58  ;;  %v1065_v0 = vsel %vm404_vm7, %v2394_v39, %v2434_v59  ;;  %v2410_v39 = vunpack.i.h.bf16 %v3350_v35 }
 0x2b1   : > { %v2453_v60 = vpop.permute.xlu0 %2452  ;;  %v3360_v36 = vpop.permute.xlu1 %2437 }
 0x2b2   : > { %v2455_v45 = vunpack.i.h.bf16 %v2453_v60  ;;  %v2454_v61 = vunpack.i.l.bf16 %v2453_v60  ;;  %v2440_v15 = vunpack.i.h.bf16 %v3360_v36  ;;  %v2439_v16 = vunpack.i.l.bf16 %v3360_v36 }
 0x2b4   : > { %v1068_v63 = vsel %vm404_vm7, %v2454_v61, %v2455_v45  ;;  %v1067_v51 = vsel %vm404_vm7, %v2395_v37, %v2454_v61  ;;  %v1168_v58 = vsel %vm461_vm6, %v2439_v16, %v2440_v15  ;;  %v2409_v45 = vunpack.i.l.bf16 %v3350_v35 }
 0x2b5   : > { %v2458_v54 = vpop.permute.xlu0 %2457  ;;  %v3366_v1 = vpop.permute.xlu1 %2442  ;;  %v2252_v2 = vpack.c.bf16 %v1068_v63, %v1066_v62  ;;  %v2254_v3 = vpack.c.bf16 %v1067_v51, %v1065_v0  ;;  %v1167_v35 = vsel %vm461_vm6, %v2404_v29, %v2439_v16  ;;  %v2415_v15 = vunpack.i.h.bf16 %v3352_v38 }
 0x2b6   : > { %v2460_v12 = vunpack.i.h.bf16 %v2458_v54  ;;  %v2459_v13 = vunpack.i.l.bf16 %v2458_v54  ;;  %v2445_v54 = vunpack.i.h.bf16 %v3366_v1 }
 0x2b7   : > { %2253 = vmatprep.subr.bf16.mxu1 %v2252_v2  ;;  %v2444_v2 = vunpack.i.l.bf16 %v3366_v1 }
 0x2b8   : > { %2255 = vmatpush1.bf16.msra.mxu1 %v2254_v3  ;;  %v1170_v52 = vsel %vm461_vm6, %v2459_v13, %v2460_v12  ;;  %v1169_v62 = vsel %vm461_vm6, %v2405_v22, %v2459_v13 }
 0x2b9   : > { %v3368_v46 = vpop.permute.xlu0 %2462  ;;  %v3370_v5 = vpop.permute.xlu1 %2447  ;;  %v2260_v61 = vpack.c.bf16 %v1170_v52, %v1168_v58  ;;  %v2262_v12 = vpack.c.bf16 %v1169_v62, %v1167_v35  ;;  %v2414_v52 = vunpack.i.l.bf16 %v3352_v38 }
 0x2ba   : > { %v2465_v34 = vunpack.i.h.bf16 %v3368_v46  ;;  %v2464_v63 = vunpack.i.l.bf16 %v3368_v46 }
 0x2bb   : > { %v1269_v38 = vsel %vm519_vm3, %v2414_v52, %v2444_v2 }
 0x2bd   : > { %v3372_v6 = vpop.permute.xlu0 %2467  ;;  %v2493_v10 = vpop.permute.xlu1 %2492 }
 0x2be   : > { %v2495_v55 = vunpack.i.h.bf16 %v2493_v10  ;;  %v2494_v14 = vunpack.i.l.bf16 %v2493_v10 }
 0x2c0   : > { %v1072_v23 = vsel %vm404_vm7, %v2494_v14, %v2495_v55  ;;  %v1071_v28 = vsel %vm404_vm7, %v2400_v48, %v2494_v14  ;;  %v1272_v14 = vsel %vm519_vm3, %v2464_v63, %v2465_v34 }
 0x2c1   : > { %v2473_v47 = vpop.permute.xlu0 %2472  ;;  %v3376_v17 = vpop.permute.xlu1 %2497 }
 0x2c2   : > { %v2475_v19 = vunpack.i.h.bf16 %v2473_v47  ;;  %v2474_v20 = vunpack.i.l.bf16 %v2473_v47 }
 0x2c4   : > { %v1070_v21 = vsel %vm404_vm7, %v2474_v20, %v2475_v19  ;;  %v1069_v27 = vsel %vm404_vm7, %v2399_v56, %v2474_v20  ;;  %v1270_v56 = vsel %vm519_vm3, %v2444_v2, %v2445_v54  ;;  %v2424_v2 = vunpack.i.l.bf16 %v3356_v9 }
 0x2c5   : > { %v2478_v31 = vpop.permute.xlu0 %2477  ;;  %v2508_v32 = vpop.permute.xlu1 %2507  ;;  %v2256_v8 = vpack.c.bf16 %v1072_v23, %v1070_v21  ;;  %v2258_v33 = vpack.c.bf16 %v1071_v28, %v1069_v27  ;;  %v2268_v21 = vpack.c.bf16 %v1272_v14, %v1270_v56  ;;  %v1271_v23 = vsel %vm519_vm3, %v2415_v15, %v2464_v63 }
 0x2c6   : > { %v2480_v59 = vunpack.i.h.bf16 %v2478_v31  ;;  %v2479_v60 = vunpack.i.l.bf16 %v2478_v31  ;;  %v2510_v36 = vunpack.i.h.bf16 %v2508_v32  ;;  %v2509_v37 = vunpack.i.l.bf16 %v2508_v32 }
 0x2c7   : > { %2257 = vmatprep.subr.bf16.mxu1 %v2256_v8  ;;  %v2470_v27 = vunpack.i.h.bf16 %v3372_v6  ;;  %v2469_v28 = vunpack.i.l.bf16 %v3372_v6  ;;  %v2420_v31 = vunpack.i.h.bf16 %v3354_v18  ;;  %v2450_v32 = vunpack.i.h.bf16 %v3370_v5 }
 0x2c8   : > { %2259 = vmatpush1.bf16.msra.mxu1 %v2258_v33  ;;  %v1172_v0 = vsel %vm461_vm6, %v2479_v60, %v2480_v59  ;;  %v1174_v51 = vsel %vm461_vm6, %v2509_v37, %v2510_v36  ;;  %v1171_v13 = vsel %vm461_vm6, %v2409_v45, %v2479_v60  ;;  %v1173_v46 = vsel %vm461_vm6, %v2410_v39, %v2509_v37 }
 0x2c9   : > { %v2483_v3 = vpop.permute.xlu0 %2482  ;;  %v3395_v10 = vpop.permute.xlu1 %2512  ;;  %2261 = vmatprep.subr.bf16.mxu1 %v2260_v61  ;;  %v2264_v55 = vpack.c.bf16 %v1174_v51, %v1172_v0  ;;  %v2266_v1 = vpack.c.bf16 %v1173_v46, %v1171_v13  ;;  %v2449_v8 = vunpack.i.l.bf16 %v3370_v5  ;;  %v2270_v59 = vpack.c.bf16 %v1271_v23, %v1269_v38 }
 0x2ca   : > { %v2485_v19 = vunpack.i.h.bf16 %v2483_v3  ;;  %v2484_v20 = vunpack.i.l.bf16 %v2483_v3  ;;  %v2419_v6 = vunpack.i.l.bf16 %v3354_v18  ;;  %v1374_v39 = vsel %vm577_vm1, %v2469_v28, %v2470_v27 }
 0x2cb   : > { %v2425_v5 = vunpack.i.h.bf16 %v3356_v9  ;;  %v1372_v63 = vsel %vm577_vm1, %v2449_v8, %v2450_v32  ;;  %v2430_v13 = vunpack.i.h.bf16 %v3358_v50  ;;  %v1371_v14 = vsel %vm577_vm1, %v2424_v2, %v2449_v8 }
 0x2cc   : > { %2263 = vmatpush1.bf16.msra.mxu1 %v2262_v12  ;;  %v1274_v60 = vsel %vm519_vm3, %v2484_v20, %v2485_v19  ;;  %v1273_v34 = vsel %vm519_vm3, %v2419_v6, %v2484_v20  ;;  %v2276_v3 = vpack.c.bf16 %v1374_v39, %v1372_v63 }
 0x2cd   : > { %v2488_v47 = vpop.permute.xlu0 %2487  ;;  %v2528_v48 = vpop.permute.xlu1 %2527  ;;  %2265 = vmatprep.subr.bf16.mxu1 %v2264_v55  ;;  %v1373_v35 = vsel %vm577_vm1, %v2425_v5, %v2469_v28 }
 0x2ce   : > { %v2530_v16 = vunpack.i.h.bf16 %v2528_v48  ;;  %v2529_v22 = vunpack.i.l.bf16 %v2528_v48  ;;  %v2490_v45 = vunpack.i.h.bf16 %v2488_v47  ;;  %v2489_v0 = vunpack.i.l.bf16 %v2488_v47 }
 0x2cf   : > { %v2278_v15 = vpack.c.bf16 %v1373_v35, %v1371_v14  ;;  %v2429_v48 = vunpack.i.l.bf16 %v3358_v50  ;;  %v2499_v50 = vunpack.i.l.bf16 %v3376_v17 }
 0x2d0   : > { %2267 = vmatpush1.bf16.msra.mxu1 %v2266_v1  ;;  %v1276_v29 = vsel %vm519_vm3, %v2529_v22, %v2530_v16  ;;  %v1275_v37 = vsel %vm519_vm3, %v2420_v31, %v2529_v22  ;;  %v1376_v47 = vsel %vm577_vm1, %v2489_v0, %v2490_v45  ;;  %v2514_v31 = vunpack.i.l.bf16 %v3395_v10 }
 0x2d1   : > { %v3411_v33 = vpop.permute.xlu0 %2502  ;;  %v3413_v58 = vpop.permute.xlu1 %2532  ;;  %2269 = vmatprep.subr.bf16.mxu1 %v2268_v21  ;;  %v2272_v36 = vpack.c.bf16 %v1276_v29, %v1274_v60  ;;  %v2274_v54 = vpack.c.bf16 %v1275_v37, %v1273_v34  ;;  %v1375_v20 = vsel %vm577_vm1, %v2429_v48, %v2489_v0  ;;  %v2500_v21 = vunpack.i.h.bf16 %v3376_v17 }
 0x2d2   : > { %v2505_v22 = vunpack.i.h.bf16 %v3411_v33  ;;  %v2504_v52 = vunpack.i.l.bf16 %v3411_v33  ;;  %v2515_v29 = vunpack.i.h.bf16 %v3395_v10  ;;  %v2535_v17 = vunpack.i.h.bf16 %v3413_v58 }
 0x2d3   : > { %v1490_v57 = vsel %vm549_vm4, %v2499_v50, %v2500_v21 }
 0x2d4   : > { %2271 = vmatpush1.bf16.msra.mxu1 %v2270_v59  ;;  %v1492_v28 = vsel %vm549_vm4, %v2504_v52, %v2505_v22  ;;  %v1491_v38 = vsel %vm549_vm4, %v2515_v29, %v2504_v52 }
 0x2d5   : > { %v3421_v61 = vpop.permute.xlu0 %2517  ;;  %v2543_v62 = vpop.permute.xlu1 %2542  ;;  %2273 = vmatprep.subr.bf16.mxu1 %v2272_v36  ;;  %v2292_v33 = vpack.c.bf16 %v1492_v28, %v1490_v57  ;;  %v1489_v36 = vsel %vm549_vm4, %v2514_v31, %v2499_v50 }
 0x2d6   : > { %v2545_v51 = vunpack.i.h.bf16 %v2543_v62  ;;  %v2544_v18 = vunpack.i.l.bf16 %v2543_v62  ;;  %v2520_v53 = vunpack.i.h.bf16 %v3421_v61  ;;  %v2519_v4 = vunpack.i.l.bf16 %v3421_v61 }
 0x2d7   : > { %v2294_v37 = vpack.c.bf16 %v1491_v38, %v1489_v36 }
 0x2d8   : > { %2275 = vmatpush1.bf16.msra.mxu1 %v2274_v54  ;;  %v1378_v12 = vsel %vm577_vm1, %v2544_v18, %v2545_v51  ;;  %v1377_v1 = vsel %vm577_vm1, %v2430_v13, %v2544_v18  ;;  %v1494_v39 = vsel %vm549_vm4, %v2519_v4, %v2520_v53 }
 0x2d9   : > { %v2523_v46 = vpop.permute.xlu0 %2522  ;;  %v3429_v55 = vpop.permute.xlu1 %2547  ;;  %2277 = vmatprep.subr.bf16.mxu1 %v2276_v3  ;;  %v2280_v9 = vpack.c.bf16 %v1378_v12, %v1376_v47  ;;  %v2282_v16 = vpack.c.bf16 %v1377_v1, %v1375_v20 }
 0x2da   : > { %v2525_v10 = vunpack.i.h.bf16 %v2523_v46  ;;  %v2524_v59 = vunpack.i.l.bf16 %v2523_v46  ;;  %v2550_v45 = vunpack.i.h.bf16 %v3429_v55 }
 0x2dc   : > { %2279 = vmatpush1.bf16.msra.mxu1 %v2278_v15  ;;  %v1493_v62 = vsel %vm549_vm4, %v2524_v59, %v2519_v4 }
 0x2dd   : > { %v3435_v56 = vpop.permute.xlu0 %2537  ;;  %v3437_v19 = vpop.permute.xlu1 %2562  ;;  %2281 = vmatprep.subr.bf16.mxu1 %v2280_v9 }
 0x2de   : > { %v2540_v60 = vunpack.i.h.bf16 %v3435_v56  ;;  %v2539_v30 = vunpack.i.l.bf16 %v3435_v56  ;;  %v2565_v47 = vunpack.i.h.bf16 %v3437_v19  ;;  %v2564_v56 = vunpack.i.l.bf16 %v3437_v19 }
 0x2e0   : > { %2283 = vmatpush1.bf16.msra.mxu1 %v2282_v16  ;;  %v1594_v34 = vsel %vm491_vm2, %v2539_v30, %v2540_v60  ;;  %v1593_v15 = vsel %vm491_vm2, %v2550_v45, %v2539_v30 }
 0x2e1   : > { %v3444_v23 = vpop.permute.xlu0 %2552  ;;  %v3446_v27 = vpop.permute.xlu1 %2572  ;;  %2285 = vmatprep.subr.bf16.mxu1 %v2284_v40 }
 0x2e2   : > { %v2555_v63 = vunpack.i.h.bf16 %v3444_v23  ;;  %v2554_v0 = vunpack.i.l.bf16 %v3444_v23  ;;  %v2575_v19 = vunpack.i.h.bf16 %v3446_v27  ;;  %v2574_v57 = vunpack.i.l.bf16 %v3446_v27 }
 0x2e4   : > { %2287 = vmatpush1.bf16.msra.mxu1 %v2286_v41  ;;  %v2534_v41 = vunpack.i.l.bf16 %v3413_v58  ;;  %v1596_v29 = vsel %vm491_vm2, %v2554_v0, %v2555_v63 }
 0x2e5   : > { %v3458_v32 = vpop.permute.xlu0 %2557  ;;  %v2583_v8 = vpop.permute.xlu1 %2582  ;;  %2289 = vmatprep.subr.bf16.mxu1 %v2288_v43  ;;  %v2549_v43 = vunpack.i.l.bf16 %v3429_v55 }
 0x2e6   : > { %v2585_v7 = vunpack.i.h.bf16 %v2583_v8  ;;  %v2584_v40 = vunpack.i.l.bf16 %v2583_v8  ;;  %v1592_v26 = vsel %vm491_vm2, %v2534_v41, %v2535_v17  ;;  %v2560_v20 = vunpack.i.h.bf16 %v3458_v32 }
 0x2e7   : > { %v1591_v2 = vsel %vm491_vm2, %v2549_v43, %v2534_v41  ;;  %v2300_v14 = vpack.c.bf16 %v1594_v34, %v1592_v26  ;;  %v2559_v16 = vunpack.i.l.bf16 %v3458_v32 }
 0x2e8   : > { %2291 = vmatpush1.bf16.msra.mxu1 %v2290_v44  ;;  %v1496_v49 = vsel %vm549_vm4, %v2584_v40, %v2585_v7  ;;  %v1495_v5 = vsel %vm549_vm4, %v2525_v10, %v2584_v40  ;;  %v2302_v28 = vpack.c.bf16 %v1593_v15, %v1591_v2  ;;  %v1694_v10 = vsel %vm434_vm0, %v2564_v56, %v2565_v47  ;;  %v2632_v47 = vld [vmem:[%s2902_s20] sm:$0xf]  ;;  %s2247_s20 = sshll.u32 %s2796_s9, 6  ;;  %s2729_s9 = smov [#allocation9]  }
 0x2e9   : > { %v3475_v6 = vpop.permute.xlu0 %2567  ;;  %v2588_v58 = vpop.permute.xlu1 %2587  ;;  %2293 = vmatprep.subr.bf16.mxu1 %v2292_v33  ;;  %v2296_v61 = vpack.c.bf16 %v1496_v49, %v1494_v39  ;;  %v2298_v54 = vpack.c.bf16 %v1495_v5, %v1493_v62  ;;  %v1595_v41 = vsel %vm491_vm2, %v2559_v16, %v2554_v0  ;;  %v2080_v15 = vstv %s2218_s17  ;;  %s3529_s12 = scalar_lea.hbm %s3579_s8, %s2247_s20  ;;  %s2653_s25 = sshll.u32 %s2729_s9, 4  ;;  %s2654_s25 = int_to_ptr.vmem [resolvable:$false] %s2653_s25 }
 0x2ea   : > { %v2590_v42 = vunpack.i.h.bf16 %v2588_v58  ;;  %v2589_v44 = vunpack.i.l.bf16 %v2588_v58  ;;  %v2570_v46 = vunpack.i.h.bf16 %v3475_v6  ;;  %v2569_v55 = vunpack.i.l.bf16 %v3475_v6 }
 0x2eb   : > { %v1693_v6 = vsel %vm434_vm0, %v2574_v57, %v2564_v56 }
 0x2ec   : > { %2295 = vmatpush1.bf16.msra.mxu1 %v2294_v37  ;;  %v1798_v9 = vsel %vm377_vm5, %v2589_v44, %v2590_v42  ;;  %v1696_v8 = vsel %vm434_vm0, %v2569_v55, %v2570_v46  ;;  %v1695_v59 = vsel %vm434_vm0, %v2575_v19, %v2569_v55 }
 0x2ed   : > { %v2578_v51 = vpop.permute.xlu0 %2577  ;;  %v2598_v18 = vpop.permute.xlu1 %2597  ;;  %2297 = vmatprep.subr.bf16.mxu1 %v2296_v61  ;;  %v2308_v38 = vpack.c.bf16 %v1696_v8, %v1694_v10  ;;  %v2310_v39 = vpack.c.bf16 %v1695_v59, %v1693_v6 }
 0x2ee   : > { %v2580_v3 = vunpack.i.h.bf16 %v2578_v51  ;;  %v2579_v35 = vunpack.i.l.bf16 %v2578_v51  ;;  %v2600_v12 = vunpack.i.h.bf16 %v2598_v18  ;;  %v2599_v13 = vunpack.i.l.bf16 %v2598_v18 }
 0x2f0   : > { %2299 = vmatpush1.bf16.msra.mxu1 %v2298_v54  ;;  %v1796_v48 = vsel %vm377_vm5, %v2579_v35, %v2580_v3  ;;  %v1598_v1 = vsel %vm491_vm2, %v2599_v13, %v2600_v12  ;;  %v1597_v17 = vsel %vm491_vm2, %v2560_v20, %v2599_v13  ;;  %v1899_v12 = vcombine.high %v3326_v24, %v3326_v24 }
 0x2f1   : > { %v2593_v22 = vpop.permute.xlu0 %2592  ;;  %v2603_v52 = vpop.permute.xlu1 %2602  ;;  %2301 = vmatprep.subr.bf16.mxu1 %v2300_v14  ;;  %v2316_v21 = vpack.c.bf16 %v1798_v9, %v1796_v48  ;;  %v2304_v31 = vpack.c.bf16 %v1598_v1, %v1596_v29  ;;  %v2306_v33 = vpack.c.bf16 %v1597_v17, %v1595_v41  ;;  %v2065_v24 = vstv %s2217_s24  ;;  %v2633_v9 = vld [vmem:[%s2907_s22] sm:$0xf]  ;;  %s329_s22 = scalar_lea.vmem [#allocation9], %s2211_s10  ;;  %s2655_s24 = scalar_lea.vmem %s2654_s25, 128 }
 0x2f2   : > { %v2595_v50 = vunpack.i.h.bf16 %v2593_v22  ;;  %v2594_v23 = vunpack.i.l.bf16 %v2593_v22  ;;  %v2605_v60 = vunpack.i.h.bf16 %v2603_v52  ;;  %v2604_v30 = vunpack.i.l.bf16 %v2603_v52  ;;  %s2122_s19 = sshll.u32 %s329_s22, 4  ;;  %s3531_s19 = int_to_ptr.vmem [resolvable:$true] %s2122_s19 }
 0x2f3   : > { %2317 = vmatprep.subr.bf16.mxu0 %v2316_v21  ;;  %v1913_v14 = vrot.slane %v1899_v12, %v2857_v11  ;;  %v2066_v48 = vmul.f32 %v2632_v47, %v2065_v24  ;;  %v2081_v1 = vmul.f32 %v2633_v9, %v2080_v15  ;;  %s2649_s23 = scalar_lea.vmem %s3531_s19, 64  ;;  %p2656_p13 = scmp.lt.s32.totalorder %s3531_s19, %s2654_s25 }
 0x2f4   : > { %v1795_v32 = vsel %vm377_vm5, %v2594_v23, %v2579_v35  ;;  %v1797_v53 = vsel %vm377_vm5, %v2595_v50, %v2589_v44  ;;  %2303 = vmatpush1.bf16.msra.mxu1 %v2302_v28  ;;  %v1698_v42 = vsel %vm434_vm0, %v2604_v30, %v2605_v60  ;;  %v2062_v50 = vstv %s2216_s26  ;;  %p2650_p10 = scmp.ne.s32.totalorder %s3531_s19, %s2649_s23  ;;  %p2657_p0 = scmp.lt.s32.totalorder %s2655_s24, %s2649_s23 }
 0x2f5   : > { %v2318_v4 = vpack.c.bf16 %v1797_v53, %v1795_v32  ;;  %v2613_v7 = vpop.permute.xlu0 %2612  ;;  %v2608_v40 = vpop.permute.xlu1 %2607  ;;  %2305 = vmatprep.subr.bf16.mxu1 %v2304_v31  ;;  %v2074_v52 = vrot.slane %v2066_v48, %v2857_v11  ;;  %v2089_v23 = vrot.slane %v2081_v1, %v2857_v11 }
 0x2f6   : > { %v2615_v27 = vunpack.i.h.bf16 %v2613_v7  ;;  %v2614_v49 = vunpack.i.l.bf16 %v2613_v7  ;;  %v2609_v43 = vunpack.i.l.bf16 %v2608_v40  ;;  %v2610_v58 = vunpack.i.h.bf16 %v2608_v40  ;;  %p2651_p11 = pnand %p2650_p10, %p2813_p5  ;;  %p2658_p1 = por %p2657_p0, %p2656_p13 }
 0x2f7   : > { %2319 = vmatpush1.bf16.msra.mxu0 %v2318_v4  ;;  %v2075_v17 = vcombine.high %v2074_v52, %v2074_v52  ;;  %v2090_v57 = vcombine.high %v2089_v23, %v2089_v23 }
 0x2f8   : > { %2307 = vmatpush1.bf16.msra.mxu1 %v2306_v33  ;;  %v1800_v44 = vsel %vm377_vm5, %v2614_v49, %v2615_v27  ;;  %v1697_v63 = vsel %vm434_vm0, %v2609_v43, %v2604_v30  ;;  %p2652_p12 = pneg %p2651_p11 }
 0x2f9   : > { %v2618_v36 = vpop.permute.xlu0 %2617  ;;  %v2623_v37 = vpop.permute.xlu1 %2622  ;;  %2309 = vmatprep.subr.bf16.mxu1 %v2308_v38 }
 0x2fa   : > { %v2620_v5 = vunpack.i.h.bf16 %v2618_v36  ;;  %v2619_v45 = vunpack.i.l.bf16 %v2618_v36  ;;  %v2625_v61 = vunpack.i.h.bf16 %v2623_v37  ;;  %v2624_v26 = vunpack.i.l.bf16 %v2623_v37  ;;  %p2659_p2 = pnand %p2658_p1, %p2652_p12 }
 0x2fc   : > { %2311 = vmatpush1.bf16.msra.mxu1 %v2310_v39  ;;  %v1700_v62 = vsel %vm434_vm0, %v2619_v45, %v2620_v5  ;;  %v1802_v34 = vsel %vm377_vm5, %v2624_v26, %v2625_v61  ;;  %v1699_v0 = vsel %vm434_vm0, %v2610_v58, %v2619_v45 }
 0x2fd   : > { %v2628_v51 = vpop.permute.xlu0 %2627  ;;  %v2312_v18 = vpack.c.bf16 %v1700_v62, %v1698_v42  ;;  %v2320_v54 = vpack.c.bf16 %v1802_v34, %v1800_v44  ;;  %v2314_v2 = vpack.c.bf16 %v1699_v0, %v1697_v63 }
 0x2fe   : > { %v2630_v3 = vunpack.i.h.bf16 %v2628_v51  ;;  %v2629_v35 = vunpack.i.l.bf16 %v2628_v51 }
 0x2ff   : > { %2313 = vmatprep.subr.bf16.mxu1 %v2312_v18  ;;  %2321 = vmatprep.subr.bf16.mxu0 %v2320_v54 }
 0x300   : > { %v1799_v13 = vsel %vm377_vm5, %v2629_v35, %v2614_v49  ;;  %v1801_v46 = vsel %vm377_vm5, %v2630_v3, %v2624_v26  ;;  %2315 = vmatpush1.bf16.msra.mxu1 %v2314_v2 }
 0x301   : > { %v2322_v55 = vpack.c.bf16 %v1801_v46, %v1799_v13 }
 0x303   : > { %1985 = vmatmul.mubr.f32.vlgmr.msra.gmra.mrb[0].mxu1 %v3330_v25  ;;  %2323 = vmatpush1.bf16.msra.mxu0 %v2322_v55 }
 0x306   : > { %2240 = vmatmul.mubr.msk.f32.vlgmr.msra.gmra.mrb[8].mxu0 %vm1917_vm10, %v1913_v14 }
 0x30a   : > { %v1896_v56 = vpop.permute.xlu1 %1895 }
 0x3d6   : > { %v1986_v20 = vpop.f32.mrb[0].mxu1 }
 0x3d7   : > { %v1987_v16 = vadd.f32 %v1986_v20, %v1896_v56  ;;  %v1988_v22 = vpop.f32.mrb[1].mxu1 }
 0x3d8   : > { %v1989_v25 = vadd.f32 %v1988_v22, %v1896_v56 }
 0x3d9   : > { %v2057_v21 = vpop.f32.mrb[8].mxu0 }
 0x3da   : > { %v2058_v28 = vadd.f32 %v2057_v21, %v1987_v16  ;;  %v2059_v29 = vpop.f32.mrb[9].mxu0 }
 0x3db   : > { %v2060_v31 = vadd.f32 %v2059_v29, %v1989_v25 }
 0x3dc   : > { %v2063_v8 = vmul.f32 %v2062_v50, %v2058_v28 }
 0x3dd   : > { %v2064_v19 = vmul.f32 %v2062_v50, %v2060_v31 }
 0x3de   : > { %v2078_v32 = vadd.f32 %v2074_v52, %v2063_v8 }
 0x3df   : > { %v2079_v53 = vadd.f32 %v2075_v17, %v2064_v19 }
 0x3e0   : > { %v2093_v4 = vadd.f32 %v2089_v23, %v2078_v32 }
 0x3e1   : > { %v2094_v7 = vadd.f32 %v2090_v57, %v2079_v53 }
 0x3e3   : > { %v2097_v40 = vcombine.low %v2093_v4, %v2094_v7 }
 0x3e5   : > { %2241 = vst.sshfl [vmem:[%s329_s22] sm:$0x33 pattern:$0x76325410] %v2097_v40 }
 0x3e6   : > { %2662 = shalt.err (!%p2659_p2)
}
 0x3e7   : > { %s2663_s17 = scalar_lea.hbm %s3529_s12, 64  ;;  %s2667_s10 = scalar_lea.hbm %s3579_s8, 128 }
 0x3e8   : > { %p2664_p3 = scmp.ne.s32.totalorder %s3529_s12, %s2663_s17  ;;  %p2668_p8 = scmp.lt.u32.totalorder %s3529_s12, %s3579_s8 }
 0x3e9   : > { %p2669_p9 = scmp.lt.u32.totalorder %s2667_s10, %s2663_s17  ;;  %p2671_p11 = scmp.lt.u32.totalorder %s2663_s17, %s3529_s12 }
 0x3ea   : > { %p2665_p4 = pnand %p2664_p3, %p2813_p5 }
 0x3eb   : > { %p2670_p10 = por %p2669_p9, %p2668_p8 }
 0x3ec   : > { %p2666_p7 = pneg %p2665_p4 }
 0x3ed   : > { %p2672_p12 = por %p2671_p11, %p2670_p10 }
 0x3ef   : > { %p2673_p13 = pnand %p2672_p12, %p2666_p7 }
 0x3f1   : > { %2676 = shalt.err (!%p2673_p13)
}
 0x3f2   : > { %2332 = dma.vmem_to_hbm [thread:$0]  (%p2813_p5), %s3531_s19, 64, %s3529_s12, %s2108_s18  }
 0x3f3 PF: > { %p2344_p0 = scmp.ge.s32.totalorder %s2715_s30, 2  ;;  %s2134_s0 = sand.u32 1, %s2703_s27  }
 0x3f4   : > { %s2135_s13 = scalar_lea.sflag [#allocation7], %s2134_s0 }
 0x3f5   : > { %p2339_p1 = pnand %p2344_p0, %p2817_p6 }
 0x3f7   : > { %2698 = dma.done.wait (!%p2339_p1), %s2135_s13, 64  }
 0x3f8   : > { %2700 = vsyncadd (!%p2339_p1), %s2135_s13, 4294967232  ;;  %p19_p2 = scmp.ge.s32.totalorder %s2800_s11, 4   ;;  %s3609_s27 = smov %s2707_s28 }
 0x3f9   : > { %s3610_s28 = smov %s2711_s29  ;;  %s3611_s29 = smov %s2811_s14 }
 0x3fa   : > { %s3612_s30 = smov %s2800_s11  ;;  %21 = sbr.rel (!%p19_p2) target bundleno = 6 (0x6), region = 102 }
 0x401   :  { %2140 = vsyncpa [#allocation7], 1 }
 0x402   :  { %2142 = vsyncpa [#allocation7 + $0x1], 1 }
 0x403   :  { %2143 = vsyncpa [#allocation8], 1 }
 0x404   :  { %2145 = vsyncpa [#allocation8 + $0x1], 1 }

</bundles_post_ra>
